<compile_context>
chip_gen: v7x
topology: tpu7x:2x2x1
jax: 0.10.0
libtpu: 0.0.40
codegen_flags: <defaults>
</compile_context>

<pallas_src>
import jax
import jax.numpy as jnp
import numpy as np
from jax.experimental import pallas as pl
from jax.experimental.pallas import tpu as pltpu


def _make_add_kernel(pack: int, vec: int):
    """Kernel over lane-packed tiles: a/b/o refs are [tbp, pack*vec]."""

    def kernel(a_ref, b_ref, w1_ref, w2_ref, o_ref):
        w1 = w1_ref[...]              # [vec, ns_pad]   VMEM-resident across grid
        w2 = w2_ref[...]              # [ns_pad, vec]   VMEM-resident across grid
        for r in range(pack):         # static unroll; pack == 128 // vec
            sl = slice(r * vec, (r + 1) * vec)
            # Fn(x*y): elementwise gate on one packed sub-row group   [tbp, vec]
            z = a_ref[:, sl] * b_ref[:, sl]
            # nn.Linear(vec, n_symbols, bias=False): z @ W1           [tbp, ns_pad]
            h = jnp.dot(z, w1, preferred_element_type=jnp.float32)
            # Sigmoid via tanh: one EUP op, no divide, exact to f32 eps
            s = 0.5 * jnp.tanh(0.5 * h) + 0.5
            # einsum('bj,ij->bi', s, sym_w) == s @ sym_w.T            [tbp, vec]
            o = jnp.dot(s.astype(w2.dtype), w2, preferred_element_type=jnp.float32)
            o_ref[:, sl] = o.astype(o_ref.dtype)

    return kernel


def add_forward(x, y, w_lin, sym_w, *, block_b=2048, dtype=jnp.float32):
    """x, y: [B, vec]; w_lin: torch nn.Linear weight [n_symbols, vec];
    sym_w: [vec, n_symbols].  `dtype=jnp.bfloat16` halves streamed bytes on
    v6e/v7x (validation then needs a looser tolerance); f32 is v5e-safe."""
    orig_B, vec = x.shape
    n_symbols = w_lin.shape[0]
    ns_pad = ((n_symbols + 127) // 128) * 128           # 200 -> 256 lanes

    # One-time weight prep (transpose + zero-pad to full lanes).  Padded h
    # columns see sigmoid(0)=0.5 but multiply zero rows of W2 -> contribute 0.
    w1 = w_lin.T.astype(dtype)                           # [vec, n_symbols]
    w2 = sym_w.T.astype(dtype)                           # [n_symbols, vec]
    if ns_pad != n_symbols:
        w1 = jnp.pad(w1, ((0, 0), (0, ns_pad - n_symbols)))
        w2 = jnp.pad(w2, ((0, ns_pad - n_symbols), (0, 0)))

    # Fold `pack` batch rows into lanes so streamed tiles are 128-lane dense.
    pack = 128 // vec if (0 < vec < 128 and 128 % vec == 0) else 1
    B = orig_B
    if B % pack:
        # TODO(synk): <= (pack-1)-row tail pad; avoids any full-array jnp.pad.
        tail = pack - B % pack
        x = jnp.concatenate([x, jnp.zeros((tail, vec), x.dtype)], axis=0)
        y = jnp.concatenate([y, jnp.zeros((tail, vec), y.dtype)], axis=0)
        B = B + tail
    Bp = B // pack
    lanes = pack * vec
    xp = x.astype(dtype).reshape(Bp, lanes)              # row-major contiguous
    yp = y.astype(dtype).reshape(Bp, lanes)

    # Tile over packed rows.  Keep the block sublane-aligned, and give the
    # "parallel" axis >= 2 steps when possible (v7x has 2 TensorCores).
    tbp = max(1, min(block_b // pack, Bp))
    if tbp < Bp and tbp % 8:
        tbp = max(8, (tbp // 8) * 8)
    if tbp == Bp and Bp >= 16:
        tbp = max(8, (Bp // 2) // 8 * 8)
    grid = pl.cdiv(Bp, tbp)

    out = pl.pallas_call(
        _make_add_kernel(pack, vec),
        out_shape=jax.ShapeDtypeStruct((Bp, lanes), jnp.float32),
        grid_spec=pltpu.PrefetchScalarGridSpec(
            num_scalar_prefetch=0,
            grid=(grid,),
            in_specs=[
                pl.BlockSpec((tbp, lanes), lambda i: (i, 0)),      # x tile
                pl.BlockSpec((tbp, lanes), lambda i: (i, 0)),      # y tile
                pl.BlockSpec((vec, ns_pad), lambda i: (0, 0)),     # W1, resident
                pl.BlockSpec((ns_pad, vec), lambda i: (0, 0)),     # W2, resident
            ],
            out_specs=pl.BlockSpec((tbp, lanes), lambda i: (i, 0)),
        ),
        compiler_params=pltpu.CompilerParams(
            dimension_semantics=("parallel",),
        ),
    )(xp, yp, w1, w2)

    return out.reshape(B, vec)[:orig_B]


def add_reference(x, y, w_lin, sym_w):
    """Plain-JAX reference matching the PyTorch forward exactly (f32)."""
    z = x.astype(jnp.float32) * y.astype(jnp.float32)
    h = jnp.dot(z, w_lin.T.astype(jnp.float32),
                precision=jax.lax.Precision.HIGHEST)
    s = 1.0 / (1.0 + jnp.exp(-h))
    return jnp.einsum("bj,ij->bi", s, sym_w.astype(jnp.float32),
                      precision=jax.lax.Precision.HIGHEST)


if __name__ == "__main__":
    VEC_SIZE = 16
    N_SYMBOLS = 200        # fixed inside the torch module
    B = 2048               # small; exercises a multi-step pipelined grid below

    key = jax.random.PRNGKey(0)
    k1, k2, k3, k4 = jax.random.split(key, 4)
    x = jax.random.normal(k1, (B, VEC_SIZE), dtype=jnp.float32)
    y = jax.random.normal(k2, (B, VEC_SIZE), dtype=jnp.float32)
    # torch nn.Linear weight layout: (out_features, in_features)
    w_lin = jax.random.normal(k3, (N_SYMBOLS, VEC_SIZE), dtype=jnp.float32) * 0.1
    # sym_w parameter layout: (vec_size, n_symbols)
    sym_w = jax.random.normal(k4, (VEC_SIZE, N_SYMBOLS), dtype=jnp.float32) * 0.1

    out = add_forward(x, y, w_lin, sym_w, block_b=512)   # 4 pipelined batch tiles
    out = jax.block_until_ready(out)
    ref = add_reference(x, y, w_lin, sym_w)
    np.testing.assert_allclose(np.asarray(out), np.asarray(ref),
                               rtol=1e-5, atol=1e-5)

    # Tiny-batch edge case (single packed row, one grid step).
    out_small = add_forward(x[:8], y[:8], w_lin, sym_w)
    out_small = jax.block_until_ready(out_small)
    np.testing.assert_allclose(np.asarray(out_small), np.asarray(ref[:8]),
                               rtol=1e-5, atol=1e-5)

    print("KERNEL_OK")
</pallas_src>

<mosaic_0001>
module attributes {stable_mosaic.version = 11 : i64} {
  func.func @kernel(%arg0: i32, %arg1: memref<64x128xf32, #tpu.memory_space<vmem>>, %arg2: memref<64x128xf32, #tpu.memory_space<vmem>>, %arg3: memref<16x256xf32, #tpu.memory_space<vmem>>, %arg4: memref<256x16xf32, #tpu.memory_space<vmem>>, %arg5: memref<64x128xf32, #tpu.memory_space<vmem>>) attributes {dimension_semantics = [#tpu.dimension_semantics<parallel>], iteration_bounds = array<i64: 4>, scalar_prefetch = 0 : i64, scratch_operands = 0 : i64, tpu.core_type = #tpu.core_type<tc>, window_params = [{transform_indices = @transform_0, window_bounds = array<i64: 64, 128>}, {transform_indices = @transform_1, window_bounds = array<i64: 64, 128>}, {pipeline_mode = #tpu.pipeline_mode<synchronous>, transform_indices = @transform_2, window_bounds = array<i64: 16, 256>}, {pipeline_mode = #tpu.pipeline_mode<synchronous>, transform_indices = @transform_3, window_bounds = array<i64: 256, 16>}, {transform_indices = @transform_4, window_bounds = array<i64: 64, 128>}]} {
    %c0 = arith.constant 0 : index
    %c0_0 = arith.constant 0 : index
    %0 = vector.load %arg3[%c0, %c0_0] : memref<16x256xf32, #tpu.memory_space<vmem>>, vector<16x256xf32>
    %c0_1 = arith.constant 0 : index
    %c0_2 = arith.constant 0 : index
    %1 = vector.load %arg4[%c0_1, %c0_2] : memref<256x16xf32, #tpu.memory_space<vmem>>, vector<256x16xf32>
    %c0_3 = arith.constant 0 : index
    %c0_4 = arith.constant 0 : index
    %2 = vector.load %arg1[%c0_3, %c0_4] : memref<64x128xf32, #tpu.memory_space<vmem>>, vector<64x16xf32>
    %c0_5 = arith.constant 0 : index
    %c0_6 = arith.constant 0 : index
    %3 = vector.load %arg2[%c0_5, %c0_6] : memref<64x128xf32, #tpu.memory_space<vmem>>, vector<64x16xf32>
    %4 = arith.mulf %2, %3 : vector<64x16xf32>
    %cst = arith.constant dense<0.000000e+00> : vector<64x256xf32>
    %5 = tpu.matmul %4, %0, %cst {dimension_numbers = #tpu.dot_dimension_numbers<[1], [0], [0], [1], [0, 0, 1, 1], [], []>} : vector<64x16xf32>, vector<16x256xf32>, vector<64x256xf32> -> vector<64x256xf32>
    %cst_7 = arith.constant 5.000000e-01 : f32
    %6 = vector.broadcast %cst_7 : f32 to vector<64x256xf32>
    %7 = arith.mulf %6, %5 : vector<64x256xf32>
    %8 = math.tanh %7 : vector<64x256xf32>
    %cst_8 = arith.constant 5.000000e-01 : f32
    %9 = vector.broadcast %cst_8 : f32 to vector<64x256xf32>
    %10 = arith.mulf %9, %8 : vector<64x256xf32>
    %cst_9 = arith.constant 5.000000e-01 : f32
    %11 = vector.broadcast %cst_9 : f32 to vector<64x256xf32>
    %12 = arith.addf %10, %11 : vector<64x256xf32>
    %cst_10 = arith.constant dense<0.000000e+00> : vector<64x16xf32>
    %13 = tpu.matmul %12, %1, %cst_10 {dimension_numbers = #tpu.dot_dimension_numbers<[1], [0], [0], [1], [0, 0, 1, 1], [], []>} : vector<64x256xf32>, vector<256x16xf32>, vector<64x16xf32> -> vector<64x16xf32>
    %c0_11 = arith.constant 0 : index
    %c0_12 = arith.constant 0 : index
    %14 = vector.load %arg5[%c0_11, %c0_12] : memref<64x128xf32, #tpu.memory_space<vmem>>, vector<64x16xf32>
    tpu.vector_store %arg5[%c0_11, %c0_12], %13 {strides = array<i32>} : memref<64x128xf32, #tpu.memory_space<vmem>>, vector<64x16xf32>,
    %c0_13 = arith.constant 0 : index
    %c16 = arith.constant 16 : index
    %15 = vector.load %arg1[%c0_13, %c16] : memref<64x128xf32, #tpu.memory_space<vmem>>, vector<64x16xf32>
    %c0_14 = arith.constant 0 : index
    %c16_15 = arith.constant 16 : index
    %16 = vector.load %arg2[%c0_14, %c16_15] : memref<64x128xf32, #tpu.memory_space<vmem>>, vector<64x16xf32>
    %17 = arith.mulf %15, %16 : vector<64x16xf32>
    %cst_16 = arith.constant dense<0.000000e+00> : vector<64x256xf32>
    %18 = tpu.matmul %17, %0, %cst_16 {dimension_numbers = #tpu.dot_dimension_numbers<[1], [0], [0], [1], [0, 0, 1, 1], [], []>} : vector<64x16xf32>, vector<16x256xf32>, vector<64x256xf32> -> vector<64x256xf32>
    %cst_17 = arith.constant 5.000000e-01 : f32
    %19 = vector.broadcast %cst_17 : f32 to vector<64x256xf32>
    %20 = arith.mulf %19, %18 : vector<64x256xf32>
    %21 = math.tanh %20 : vector<64x256xf32>
    %cst_18 = arith.constant 5.000000e-01 : f32
    %22 = vector.broadcast %cst_18 : f32 to vector<64x256xf32>
    %23 = arith.mulf %22, %21 : vector<64x256xf32>
    %cst_19 = arith.constant 5.000000e-01 : f32
    %24 = vector.broadcast %cst_19 : f32 to vector<64x256xf32>
    %25 = arith.addf %23, %24 : vector<64x256xf32>
    %cst_20 = arith.constant dense<0.000000e+00> : vector<64x16xf32>
    %26 = tpu.matmul %25, %1, %cst_20 {dimension_numbers = #tpu.dot_dimension_numbers<[1], [0], [0], [1], [0, 0, 1, 1], [], []>} : vector<64x256xf32>, vector<256x16xf32>, vector<64x16xf32> -> vector<64x16xf32>
    %c0_21 = arith.constant 0 : index
    %c16_22 = arith.constant 16 : index
    %27 = vector.load %arg5[%c0_21, %c16_22] : memref<64x128xf32, #tpu.memory_space<vmem>>, vector<64x16xf32>
    tpu.vector_store %arg5[%c0_21, %c16_22], %26 {strides = array<i32>} : memref<64x128xf32, #tpu.memory_space<vmem>>, vector<64x16xf32>,
    %c0_23 = arith.constant 0 : index
    %c32 = arith.constant 32 : index
    %28 = vector.load %arg1[%c0_23, %c32] : memref<64x128xf32, #tpu.memory_space<vmem>>, vector<64x16xf32>
    %c0_24 = arith.constant 0 : index
    %c32_25 = arith.constant 32 : index
    %29 = vector.load %arg2[%c0_24, %c32_25] : memref<64x128xf32, #tpu.memory_space<vmem>>, vector<64x16xf32>
    %30 = arith.mulf %28, %29 : vector<64x16xf32>
    %cst_26 = arith.constant dense<0.000000e+00> : vector<64x256xf32>
    %31 = tpu.matmul %30, %0, %cst_26 {dimension_numbers = #tpu.dot_dimension_numbers<[1], [0], [0], [1], [0, 0, 1, 1], [], []>} : vector<64x16xf32>, vector<16x256xf32>, vector<64x256xf32> -> vector<64x256xf32>
    %cst_27 = arith.constant 5.000000e-01 : f32
    %32 = vector.broadcast %cst_27 : f32 to vector<64x256xf32>
    %33 = arith.mulf %32, %31 : vector<64x256xf32>
    %34 = math.tanh %33 : vector<64x256xf32>
    %cst_28 = arith.constant 5.000000e-01 : f32
    %35 = vector.broadcast %cst_28 : f32 to vector<64x256xf32>
    %36 = arith.mulf %35, %34 : vector<64x256xf32>
    %cst_29 = arith.constant 5.000000e-01 : f32
    %37 = vector.broadcast %cst_29 : f32 to vector<64x256xf32>
    %38 = arith.addf %36, %37 : vector<64x256xf32>
    %cst_30 = arith.constant dense<0.000000e+00> : vector<64x16xf32>
    %39 = tpu.matmul %38, %1, %cst_30 {dimension_numbers = #tpu.dot_dimension_numbers<[1], [0], [0], [1], [0, 0, 1, 1], [], []>} : vector<64x256xf32>, vector<256x16xf32>, vector<64x16xf32> -> vector<64x16xf32>
    %c0_31 = arith.constant 0 : index
    %c32_32 = arith.constant 32 : index
    %40 = vector.load %arg5[%c0_31, %c32_32] : memref<64x128xf32, #tpu.memory_space<vmem>>, vector<64x16xf32>
    tpu.vector_store %arg5[%c0_31, %c32_32], %39 {strides = array<i32>} : memref<64x128xf32, #tpu.memory_space<vmem>>, vector<64x16xf32>,
    %c0_33 = arith.constant 0 : index
    %c48 = arith.constant 48 : index
    %41 = vector.load %arg1[%c0_33, %c48] : memref<64x128xf32, #tpu.memory_space<vmem>>, vector<64x16xf32>
    %c0_34 = arith.constant 0 : index
    %c48_35 = arith.constant 48 : index
    %42 = vector.load %arg2[%c0_34, %c48_35] : memref<64x128xf32, #tpu.memory_space<vmem>>, vector<64x16xf32>
    %43 = arith.mulf %41, %42 : vector<64x16xf32>
    %cst_36 = arith.constant dense<0.000000e+00> : vector<64x256xf32>
    %44 = tpu.matmul %43, %0, %cst_36 {dimension_numbers = #tpu.dot_dimension_numbers<[1], [0], [0], [1], [0, 0, 1, 1], [], []>} : vector<64x16xf32>, vector<16x256xf32>, vector<64x256xf32> -> vector<64x256xf32>
    %cst_37 = arith.constant 5.000000e-01 : f32
    %45 = vector.broadcast %cst_37 : f32 to vector<64x256xf32>
    %46 = arith.mulf %45, %44 : vector<64x256xf32>
    %47 = math.tanh %46 : vector<64x256xf32>
    %cst_38 = arith.constant 5.000000e-01 : f32
    %48 = vector.broadcast %cst_38 : f32 to vector<64x256xf32>
    %49 = arith.mulf %48, %47 : vector<64x256xf32>
    %cst_39 = arith.constant 5.000000e-01 : f32
    %50 = vector.broadcast %cst_39 : f32 to vector<64x256xf32>
    %51 = arith.addf %49, %50 : vector<64x256xf32>
    %cst_40 = arith.constant dense<0.000000e+00> : vector<64x16xf32>
    %52 = tpu.matmul %51, %1, %cst_40 {dimension_numbers = #tpu.dot_dimension_numbers<[1], [0], [0], [1], [0, 0, 1, 1], [], []>} : vector<64x256xf32>, vector<256x16xf32>, vector<64x16xf32> -> vector<64x16xf32>
    %c0_41 = arith.constant 0 : index
    %c48_42 = arith.constant 48 : index
    %53 = vector.load %arg5[%c0_41, %c48_42] : memref<64x128xf32, #tpu.memory_space<vmem>>, vector<64x16xf32>
    tpu.vector_store %arg5[%c0_41, %c48_42], %52 {strides = array<i32>} : memref<64x128xf32, #tpu.memory_space<vmem>>, vector<64x16xf32>,
    %c0_43 = arith.constant 0 : index
    %c64 = arith.constant 64 : index
    %54 = vector.load %arg1[%c0_43, %c64] : memref<64x128xf32, #tpu.memory_space<vmem>>, vector<64x16xf32>
    %c0_44 = arith.constant 0 : index
    %c64_45 = arith.constant 64 : index
    %55 = vector.load %arg2[%c0_44, %c64_45] : memref<64x128xf32, #tpu.memory_space<vmem>>, vector<64x16xf32>
    %56 = arith.mulf %54, %55 : vector<64x16xf32>
    %cst_46 = arith.constant dense<0.000000e+00> : vector<64x256xf32>
    %57 = tpu.matmul %56, %0, %cst_46 {dimension_numbers = #tpu.dot_dimension_numbers<[1], [0], [0], [1], [0, 0, 1, 1], [], []>} : vector<64x16xf32>, vector<16x256xf32>, vector<64x256xf32> -> vector<64x256xf32>
    %cst_47 = arith.constant 5.000000e-01 : f32
    %58 = vector.broadcast %cst_47 : f32 to vector<64x256xf32>
    %59 = arith.mulf %58, %57 : vector<64x256xf32>
    %60 = math.tanh %59 : vector<64x256xf32>
    %cst_48 = arith.constant 5.000000e-01 : f32
    %61 = vector.broadcast %cst_48 : f32 to vector<64x256xf32>
    %62 = arith.mulf %61, %60 : vector<64x256xf32>
    %cst_49 = arith.constant 5.000000e-01 : f32
    %63 = vector.broadcast %cst_49 : f32 to vector<64x256xf32>
    %64 = arith.addf %62, %63 : vector<64x256xf32>
    %cst_50 = arith.constant dense<0.000000e+00> : vector<64x16xf32>
    %65 = tpu.matmul %64, %1, %cst_50 {dimension_numbers = #tpu.dot_dimension_numbers<[1], [0], [0], [1], [0, 0, 1, 1], [], []>} : vector<64x256xf32>, vector<256x16xf32>, vector<64x16xf32> -> vector<64x16xf32>
    %c0_51 = arith.constant 0 : index
    %c64_52 = arith.constant 64 : index
    %66 = vector.load %arg5[%c0_51, %c64_52] : memref<64x128xf32, #tpu.memory_space<vmem>>, vector<64x16xf32>
    tpu.vector_store %arg5[%c0_51, %c64_52], %65 {strides = array<i32>} : memref<64x128xf32, #tpu.memory_space<vmem>>, vector<64x16xf32>,
    %c0_53 = arith.constant 0 : index
    %c80 = arith.constant 80 : index
    %67 = vector.load %arg1[%c0_53, %c80] : memref<64x128xf32, #tpu.memory_space<vmem>>, vector<64x16xf32>
    %c0_54 = arith.constant 0 : index
    %c80_55 = arith.constant 80 : index
    %68 = vector.load %arg2[%c0_54, %c80_55] : memref<64x128xf32, #tpu.memory_space<vmem>>, vector<64x16xf32>
    %69 = arith.mulf %67, %68 : vector<64x16xf32>
    %cst_56 = arith.constant dense<0.000000e+00> : vector<64x256xf32>
    %70 = tpu.matmul %69, %0, %cst_56 {dimension_numbers = #tpu.dot_dimension_numbers<[1], [0], [0], [1], [0, 0, 1, 1], [], []>} : vector<64x16xf32>, vector<16x256xf32>, vector<64x256xf32> -> vector<64x256xf32>
    %cst_57 = arith.constant 5.000000e-01 : f32
    %71 = vector.broadcast %cst_57 : f32 to vector<64x256xf32>
    %72 = arith.mulf %71, %70 : vector<64x256xf32>
    %73 = math.tanh %72 : vector<64x256xf32>
    %cst_58 = arith.constant 5.000000e-01 : f32
    %74 = vector.broadcast %cst_58 : f32 to vector<64x256xf32>
    %75 = arith.mulf %74, %73 : vector<64x256xf32>
    %cst_59 = arith.constant 5.000000e-01 : f32
    %76 = vector.broadcast %cst_59 : f32 to vector<64x256xf32>
    %77 = arith.addf %75, %76 : vector<64x256xf32>
    %cst_60 = arith.constant dense<0.000000e+00> : vector<64x16xf32>
    %78 = tpu.matmul %77, %1, %cst_60 {dimension_numbers = #tpu.dot_dimension_numbers<[1], [0], [0], [1], [0, 0, 1, 1], [], []>} : vector<64x256xf32>, vector<256x16xf32>, vector<64x16xf32> -> vector<64x16xf32>
    %c0_61 = arith.constant 0 : index
    %c80_62 = arith.constant 80 : index
    %79 = vector.load %arg5[%c0_61, %c80_62] : memref<64x128xf32, #tpu.memory_space<vmem>>, vector<64x16xf32>
    tpu.vector_store %arg5[%c0_61, %c80_62], %78 {strides = array<i32>} : memref<64x128xf32, #tpu.memory_space<vmem>>, vector<64x16xf32>,
    %c0_63 = arith.constant 0 : index
    %c96 = arith.constant 96 : index
    %80 = vector.load %arg1[%c0_63, %c96] : memref<64x128xf32, #tpu.memory_space<vmem>>, vector<64x16xf32>
    %c0_64 = arith.constant 0 : index
    %c96_65 = arith.constant 96 : index
    %81 = vector.load %arg2[%c0_64, %c96_65] : memref<64x128xf32, #tpu.memory_space<vmem>>, vector<64x16xf32>
    %82 = arith.mulf %80, %81 : vector<64x16xf32>
    %cst_66 = arith.constant dense<0.000000e+00> : vector<64x256xf32>
    %83 = tpu.matmul %82, %0, %cst_66 {dimension_numbers = #tpu.dot_dimension_numbers<[1], [0], [0], [1], [0, 0, 1, 1], [], []>} : vector<64x16xf32>, vector<16x256xf32>, vector<64x256xf32> -> vector<64x256xf32>
    %cst_67 = arith.constant 5.000000e-01 : f32
    %84 = vector.broadcast %cst_67 : f32 to vector<64x256xf32>
    %85 = arith.mulf %84, %83 : vector<64x256xf32>
    %86 = math.tanh %85 : vector<64x256xf32>
    %cst_68 = arith.constant 5.000000e-01 : f32
    %87 = vector.broadcast %cst_68 : f32 to vector<64x256xf32>
    %88 = arith.mulf %87, %86 : vector<64x256xf32>
    %cst_69 = arith.constant 5.000000e-01 : f32
    %89 = vector.broadcast %cst_69 : f32 to vector<64x256xf32>
    %90 = arith.addf %88, %89 : vector<64x256xf32>
    %cst_70 = arith.constant dense<0.000000e+00> : vector<64x16xf32>
    %91 = tpu.matmul %90, %1, %cst_70 {dimension_numbers = #tpu.dot_dimension_numbers<[1], [0], [0], [1], [0, 0, 1, 1], [], []>} : vector<64x256xf32>, vector<256x16xf32>, vector<64x16xf32> -> vector<64x16xf32>
    %c0_71 = arith.constant 0 : index
    %c96_72 = arith.constant 96 : index
    %92 = vector.load %arg5[%c0_71, %c96_72] : memref<64x128xf32, #tpu.memory_space<vmem>>, vector<64x16xf32>
    tpu.vector_store %arg5[%c0_71, %c96_72], %91 {strides = array<i32>} : memref<64x128xf32, #tpu.memory_space<vmem>>, vector<64x16xf32>,
    %c0_73 = arith.constant 0 : index
    %c112 = arith.constant 112 : index
    %93 = vector.load %arg1[%c0_73, %c112] : memref<64x128xf32, #tpu.memory_space<vmem>>, vector<64x16xf32>
    %c0_74 = arith.constant 0 : index
    %c112_75 = arith.constant 112 : index
    %94 = vector.load %arg2[%c0_74, %c112_75] : memref<64x128xf32, #tpu.memory_space<vmem>>, vector<64x16xf32>
    %95 = arith.mulf %93, %94 : vector<64x16xf32>
    %cst_76 = arith.constant dense<0.000000e+00> : vector<64x256xf32>
    %96 = tpu.matmul %95, %0, %cst_76 {dimension_numbers = #tpu.dot_dimension_numbers<[1], [0], [0], [1], [0, 0, 1, 1], [], []>} : vector<64x16xf32>, vector<16x256xf32>, vector<64x256xf32> -> vector<64x256xf32>
    %cst_77 = arith.constant 5.000000e-01 : f32
    %97 = vector.broadcast %cst_77 : f32 to vector<64x256xf32>
    %98 = arith.mulf %97, %96 : vector<64x256xf32>
    %99 = math.tanh %98 : vector<64x256xf32>
    %cst_78 = arith.constant 5.000000e-01 : f32
    %100 = vector.broadcast %cst_78 : f32 to vector<64x256xf32>
    %101 = arith.mulf %100, %99 : vector<64x256xf32>
    %cst_79 = arith.constant 5.000000e-01 : f32
    %102 = vector.broadcast %cst_79 : f32 to vector<64x256xf32>
    %103 = arith.addf %101, %102 : vector<64x256xf32>
    %cst_80 = arith.constant dense<0.000000e+00> : vector<64x16xf32>
    %104 = tpu.matmul %103, %1, %cst_80 {dimension_numbers = #tpu.dot_dimension_numbers<[1], [0], [0], [1], [0, 0, 1, 1], [], []>} : vector<64x256xf32>, vector<256x16xf32>, vector<64x16xf32> -> vector<64x16xf32>
    %c0_81 = arith.constant 0 : index
    %c112_82 = arith.constant 112 : index
    %105 = vector.load %arg5[%c0_81, %c112_82] : memref<64x128xf32, #tpu.memory_space<vmem>>, vector<64x16xf32>
    tpu.vector_store %arg5[%c0_81, %c112_82], %104 {strides = array<i32>} : memref<64x128xf32, #tpu.memory_space<vmem>>, vector<64x16xf32>,
    return
  }
  func.func @transform_0(%arg0: i32) -> (i32, i32) {
    %c0_i32 = arith.constant 0 : i32
    %c0_i32_0 = arith.constant 0 : i32
    return %arg0, %c0_i32 : i32, i32
  }
  func.func @transform_1(%arg0: i32) -> (i32, i32) {
    %c0_i32 = arith.constant 0 : i32
    %c0_i32_0 = arith.constant 0 : i32
    return %arg0, %c0_i32 : i32, i32
  }
  func.func @transform_2(%arg0: i32) -> (i32, i32) {
    %c0_i32 = arith.constant 0 : i32
    %c0_i32_0 = arith.constant 0 : i32
    %c0_i32_1 = arith.constant 0 : i32
    return %c0_i32, %c0_i32_0 : i32, i32
  }
  func.func @transform_3(%arg0: i32) -> (i32, i32) {
    %c0_i32 = arith.constant 0 : i32
    %c0_i32_0 = arith.constant 0 : i32
    %c0_i32_1 = arith.constant 0 : i32
    return %c0_i32, %c0_i32_0 : i32, i32
  }
  func.func @transform_4(%arg0: i32) -> (i32, i32) {
    %c0_i32 = arith.constant 0 : i32
    %c0_i32_0 = arith.constant 0 : i32
    return %arg0, %c0_i32 : i32, i32
  }
}

</mosaic_0001>

<bundles_post_ra>
// kernel: tpu_custom_call.1
= control target key start
LH: loop header
LB: loop body
LE: loop exit
PB: predicated region body
PF: predicated region fallthrough
CT: control target
= control target key end

     0   :  { %9 = vsyncpa [#allocation3], 0  ;;  %s5651_s0 = inlined_call_operand.vmem [shape: f32[256,128], index: 0, kind: input, shape index: {}]   ;;  %s5652_s1 = inlined_call_operand.hbm [shape: f32[256,128], index: 1, kind: input, shape index: {}]   ;;  %s5653_s2 = inlined_call_operand.vmem [shape: f32[16,256], index: 2, kind: input, shape index: {}]   ;;  %s5654_s3 = inlined_call_operand.vmem [shape: f32[256,16], index: 3, kind: input, shape index: {}]   ;;  %s5655_s4 = inlined_call_operand.hbm [shape: f32[256,128], index: 4, kind: output, shape index: {}]  }
   0x1   :  { %11 = vsyncpa [#allocation3 + $0x1], 0 }
   0x2   :  { %12 = vsyncpa [#allocation4], 0 }
   0x3   :  { %14 = vsyncpa [#allocation4 + $0x1], 0  ;;  %s4708_s15 = smov 0   ;;  %s4710_s16 = smov 0  }
   0x4   :  { %s4712_s17 = smov 0   ;;  %s4714_s18 = smov 0  }
   0x5 LB: > { %s4729_s19 = sadd.s32 4294967295, %s4667_s18   ;;  %s3423_s20 = sadd.s32 4294967294, %s4667_s18   ;;  %s4667_s18 = sphi %s4714_s18, %s5667_s18   ;;  %s4663_s17 = sphi %s4712_s17, %s5666_s17   ;;  %s4659_s16 = sphi %s4710_s16, %s5665_s16   ;;  %s4655_s15 = sphi %s4708_s15, %s5664_s15  }
   0x6   : > { %s4733_s21 = sadd.s32 1, %s4667_s18   ;;  %s53_s22 = sadd.s32 1, %s4663_s17 }
   0x7   : > { %s50_s23 = ssub.s32 %s4667_s18, %s4733_s21  ;;  %p60_p0 = scmp.ne.s32.totalorder %s4663_s17, %s4659_s16 }
   0x8   : > { %p51_p1 = scmp.eq.s32.totalorder %s50_s23, 0  ;;  %p61_p2 = scmp.eq.s32.totalorder %s4667_s18, 0 }
   0x9   : > { %p66_p3 = scmp.ne.s32.totalorder %s4659_s16, %s4655_s15  ;;  %p67_p4 = scmp.eq.s32.totalorder %s4729_s19, 0 }
   0xa   : > { %s4745_s24 = scalar_select %p51_p1, %s4663_s17, %s53_s22  }
   0xb   : > { %p4747_p5 = por %p61_p2, %p60_p0  ;;  %p4751_p6 = por %p67_p4, %p66_p3 }
   0xc   : > { %p132_p7 = scmp.eq.s32.totalorder %s4729_s19, 3  ;;  %p138_p8 = scmp.eq.s32.totalorder %s3423_s20, 3 }
   0xd   : > { %p4269_p9 = scmp.lt.s32.totalorder %s4667_s18, 4  ;;  %s173_s29 = sand.u32 1, %s4663_s17  }
   0xe   : > { %p4757_p10 = por %p132_p7, %p60_p0  ;;  %p4761_p11 = por %p138_p8, %p66_p3 }
   0xf   : > { %s3503_s30 = sshll.u32 %s4667_s18, 10  ;;  %s3426_s5 = sshll.u32 %s173_s29, 6 }
  0x10   : > { %s5659_s27 = scalar_select %p4757_p10, 1, 0 }
  0x11   : > { %s5660_s28 = scalar_select %p4761_p11, 1, 0 }
  0x12   : > { %s4770_s8 = scalar_lea.hbm %s5652_s1, %s3503_s30  ;;  %s177_s9 = scalar_lea.vmem [#allocation2], %s3426_s5 }
  0x13   : > { %s184_s10 = sshll.u32 %s177_s9, 4  ;;  %p4774_p12 = pnand %p4269_p9, %p4747_p5  ;;  %s4778_s10 = int_to_ptr.vmem [resolvable:$true] %s184_s10 }
  0x14   : > { %s4780_s12 = scalar_lea.sflag [#allocation3], %s173_s29  ;;  %s4571_s13 = scalar_lea.hbm %s4770_s8, 1024 }
  0x15   : > { %p4572_p13 = scmp.ne.s32.totalorder %s4770_s8, %s4571_s13  ;;  %p4573_p0 = pneg %p4774_p12 }
  0x16   : > { %s4576_s22 = scalar_lea.hbm %s5652_s1, 4096  ;;  %p4577_p3 = scmp.lt.u32.totalorder %s4770_s8, %s5652_s1 }
  0x17   : > { %p4574_p1 = pnand %p4573_p0, %p4572_p13  ;;  %p4578_p4 = scmp.lt.u32.totalorder %s4576_s22, %s4571_s13 }
  0x18   : > { %p4580_p7 = scmp.lt.u32.totalorder %s4571_s13, %s4770_s8 }
  0x19   : > { %p4575_p2 = pneg %p4574_p1  ;;  %p4579_p5 = por %p4578_p4, %p4577_p3 }
  0x1b   : > { %p4581_p8 = por %p4580_p7, %p4579_p5 }
  0x1d   : > { %p4582_p9 = pnand %p4581_p8, %p4575_p2 }
  0x1f   : > { %4585 = shalt.err (!%p4582_p9)
}
  0x20   : > { %s4586_s29 = scalar_lea.vmem %s4778_s10, 1024  ;;  %s4669_s30 = smov [#allocation2]  }
  0x21   : > { %p4587_p13 = scmp.ne.s32.totalorder %s4778_s10, %s4586_s29  ;;  %s4591_s5 = sshll.u32 %s4669_s30, 4  ;;  %s4592_s5 = int_to_ptr.vmem [resolvable:$false] %s4591_s5 }
  0x22   : > { %s4593_s6 = scalar_lea.vmem %s4592_s5, 2048  ;;  %p4594_p10 = scmp.lt.s32.totalorder %s4778_s10, %s4592_s5 }
  0x23   : > { %p4589_p1 = pnand %p4587_p13, %p4573_p0  ;;  %p4595_p3 = scmp.lt.s32.totalorder %s4593_s6, %s4586_s29 }
  0x25   : > { %p4590_p11 = pneg %p4589_p1  ;;  %p4596_p4 = por %p4595_p3, %p4594_p10 }
  0x27   : > { %p4597_p5 = pnand %p4596_p4, %p4590_p11 }
  0x29   : > { %4600 = shalt.err (!%p4597_p5)
}
  0x2a   : > { %s4670_s7 = smov 128   ;;  %s4671_s9 = smov 8  }
  0x2b   : > { %4264 = dma.hbm_to_vmem [thread:$0]  (!%p4774_p12), %s4770_s8, 1024, %s4778_s10, %s4780_s12, %s4670_s7, %s4670_s7, %s4671_s9  }
  0x2c   : > { %p3429_p0 = scmp.ge.s32.totalorder %s4667_s18, 1  ;;  %p192_p2 = scmp.lt.s32.totalorder %s4667_s18, 5 }
  0x2e   : > { %p193_p7 = pnand %p3429_p0, %p192_p2 }
  0x2f   : > { %s4811_s13 = sand.u32 (!%p193_p7), 1, %s4659_s16  }
  0x30   : > { %196 = sbr.rel (%p193_p7) target bundleno = 976 (0x3d0), region = 36  ;;  %s3430_s14 = sshll.u32 (!%p193_p7), %s4811_s13, 6 }
  0x31   : > { %s199_s20 = scalar_lea.sflag (!%p193_p7), [#allocation3], %s4811_s13  ;;  %s4817_s22 = scalar_lea.vmem (!%p193_p7), [#allocation2], %s3430_s14 }
  0x37   : > { %4646 = dma.done.wait (%p4751_p6), %s199_s20, 1024  }
  0x38   : > { %4648 = vsyncadd (%p4751_p6), %s199_s20, 4294966272  ;;  %s3432_s8 = sshll.u32 %s4729_s19, 3  ;;  %v4672_v0 = vmov 0.0   ;;  %v623_v2 = vld [vmem:[%s4817_s22] sm:$0xff]  ;;  %v624_v5 = vld [vmem:[%s4817_s22 + $0x8] sm:$0xff]  ;;  %s4673_s26 = smov 112  }
  0x39   : > { %p233_p10 = scmp.lt.s32.totalorder %s3432_s8, 31  ;;  %389 = vmatprep.mubr.f32.mxu0 %v4672_v0  ;;  %v625_v7 = vld [vmem:[%s4817_s22 + $0x10] sm:$0xff]  ;;  %v626_v10 = vld [vmem:[%s4817_s22 + $0x18] sm:$0xff]  ;;  %v627_v14 = vld [vmem:[%s4817_s22 + $0x20] sm:$0xff]  ;;  %vm300_vm0 = vcmask 130048   ;;  %s4677_s11 = smov 48  }
  0x3a   : > { %v628_v16 = vld [vmem:[%s4817_s22 + $0x28] sm:$0xff]  ;;  %v243_v18 = vld [vmem:[%s5653_s2 + $0x18] sm:$0xff]  ;;  %v240_v20 = vld [vmem:[%s5653_s2] sm:$0xff]  ;;  %s4678_s12 = smov 32   ;;  %s5375_s25 = scalar_lea.vmem [#allocation5], %s3430_s14  ;;  %vm993_vm1 = vcmask 261248  }
  0x3b   : > { %s5669_s8 = smov (!%p233_p10, %s3432_s8), 31  ;;  %v241_v17 = vld [vmem:[%s5653_s2 + $0x8] sm:$0xff]  ;;  %v242_v21 = vld [vmem:[%s5653_s2 + $0x10] sm:$0xff]  ;;  %v630_v28 = vld [vmem:[%s4817_s22 + $0x38] sm:$0xff]  ;;  %vm1380_vm2 = vcmask 392448   ;;  %vm1767_vm3 = vcmask 523648  }
  0x3c   : > { %s3433_s10 = sshll.u32 %s5669_s8, 3  ;;  %v4860_v19 = vpack.c.bf16 %v243_v18, %v241_v17  ;;  %v4872_v23 = vpack.c.bf16 %v242_v21, %v240_v20  ;;  %v629_v26 = vld [vmem:[%s4817_s22 + $0x30] sm:$0xff]  ;;  %s4674_s22 = smov 96   ;;  %v260_v41 = vld [vmem:[%s5654_s3 + $0x80] sm:$0xff]  ;;  %v261_v42 = vld [vmem:[%s5654_s3 + $0x88] sm:$0xff]  ;;  %vm2154_vm4 = vcmask 654848  }
  0x3d   : > { %s4828_s23 = scalar_lea.vmem %s5651_s0, %s3433_s10  ;;  %s4675_s8 = smov 80   ;;  %v5047_v43 = vpack.c.bf16 %v261_v42, %v260_v41  ;;  %v244_v44 = vld [vmem:[%s5654_s3] sm:$0xff]  ;;  %v245_v45 = vld [vmem:[%s5654_s3 + $0x8] sm:$0xff]  ;;  %v262_v48 = vld [vmem:[%s5654_s3 + $0x90] sm:$0xff]  ;;  %vm2541_vm5 = vcmask 786048   ;;  %vm2928_vm6 = vcmask 917248  }
  0x3e   : > { %v615_v1 = vld [vmem:[%s4828_s23] sm:$0xff]  ;;  %v616_v3 = vld [vmem:[%s4828_s23 + $0x8] sm:$0xff]  ;;  %v617_v6 = vld [vmem:[%s4828_s23 + $0x10] sm:$0xff]  ;;  %3954 = vmatprep.subr.bf16.mxu0 %v4860_v19  ;;  %s4676_s10 = smov 64   ;;  %v5055_v46 = vpack.c.bf16 %v245_v45, %v244_v44  ;;  %vm3315_vm7 = vcmask 1048448   ;;  %s3504_s14 = sshll.u32 %s4729_s19, 10 }
  0x3f   : > { %v4833_v4 = vmul.f32 %v623_v2, %v615_v1  ;;  %v4838_v8 = vmul.f32 %v625_v7, %v617_v6  ;;  %v618_v9 = vld [vmem:[%s4828_s23 + $0x18] sm:$0xff]  ;;  %v4844_v11 = vmul.f32 %v624_v5, %v616_v3  ;;  %v619_v13 = vld [vmem:[%s4828_s23 + $0x20] sm:$0xff]  ;;  %v620_v15 = vld [vmem:[%s4828_s23 + $0x28] sm:$0xff]  ;;  %3956 = vmatpush1.bf16.msra.mxu0 %v4872_v23  ;;  %3958 = vmatprep.subr.bf16.mxu1 %v5047_v43  ;;  %p5662_p11 = scmp.ne.s32.totalorder %s5659_s27, 0  ;;  %s4680_s19 = smov [#allocation5]  }
  0x40   : > { %v4848_v12 = vmul.f32 %v626_v10, %v618_v9  ;;  %v4870_v22 = vmul.f32 %v627_v14, %v619_v13  ;;  %v4876_v24 = vmul.f32 %v628_v16, %v620_v15  ;;  %v621_v25 = vld [vmem:[%s4828_s23 + $0x30] sm:$0xff]  ;;  %v622_v27 = vld [vmem:[%s4828_s23 + $0x38] sm:$0xff]  ;;  %3990 = vmatprep.subr.bf16.mxu0 %v4860_v19  ;;  %s4679_s23 = smov 16   ;;  %3960 = vmatpush3.bf16.msra.mxu1 %v5055_v46  ;;  %v264_v55 = vld [vmem:[%s5654_s3 + $0xa0] sm:$0xff] }
  0x41   : > { %647 = vrot.lane.b32.xlu0 %v4833_v4, %s4673_s26  ;;  %651 = vrot.lane.b32.xlu1 %v4838_v8, %s4673_s26  ;;  %v4887_v29 = vmul.f32 %v629_v26, %v621_v25  ;;  %v4891_v30 = vmul.f32 %v630_v28, %v622_v27  ;;  %v263_v49 = vld [vmem:[%s5654_s3 + $0x98] sm:$0xff]  ;;  %v246_v51 = vld [vmem:[%s5654_s3 + $0x10] sm:$0xff] }
  0x42   : > { %3434 = vmatmul.mubr.msk.f32.vlgmr.msra.gmra.mrb[0].mxu0 %vm300_vm0, %v4833_v4  ;;  %v5067_v50 = vpack.c.bf16 %v263_v49, %v262_v48  ;;  %v247_v52 = vld [vmem:[%s5654_s3 + $0x18] sm:$0xff]  ;;  %v265_v56 = vld [vmem:[%s5654_s3 + $0xa8] sm:$0xff]  ;;  %v248_v58 = vld [vmem:[%s5654_s3 + $0x20] sm:$0xff] }
  0x43   : > { %395 = vmatprep.mubr.f32.mxu0 %v4672_v0  ;;  %3992 = vmatpush1.bf16.msra.mxu0 %v4872_v23  ;;  %v5075_v53 = vpack.c.bf16 %v247_v52, %v246_v51  ;;  %v5087_v57 = vpack.c.bf16 %v265_v56, %v264_v55  ;;  %v249_v59 = vld [vmem:[%s5654_s3 + $0x28] sm:$0xff]  ;;  %v266_v62 = vld [vmem:[%s5654_s3 + $0xb0] sm:$0xff]  ;;  %v267_v63 = vld [vmem:[%s5654_s3 + $0xb8] sm:$0xff] }
  0x44   : > { %4026 = vmatprep.subr.bf16.mxu0 %v4860_v19  ;;  %3962 = vmatprep.subr.bf16.mxu1 %v5067_v50  ;;  %v5095_v60 = vpack.c.bf16 %v249_v59, %v248_v58  ;;  %v5107_v1 = vpack.c.bf16 %v267_v63, %v266_v62  ;;  %v250_v2 = vld [vmem:[%s5654_s3 + $0x30] sm:$0xff]  ;;  %v251_v3 = vld [vmem:[%s5654_s3 + $0x38] sm:$0xff]  ;;  %v268_v6 = vld [vmem:[%s5654_s3 + $0xc0] sm:$0xff] }
  0x45   : > { %649 = vrot.lane.b32.xlu0 %v4844_v11, %s4673_s26  ;;  %653 = vrot.lane.b32.xlu1 %v4848_v12, %s4673_s26  ;;  %v269_v7 = vld [vmem:[%s5654_s3 + $0xc8] sm:$0xff]  ;;  %v252_v9 = vld [vmem:[%s5654_s3 + $0x40] sm:$0xff] }
  0x46   : > { %3435 = vmatmul.mubr.msk.f32.gmra.mrb[2].mxu0 %vm300_vm0, %v4844_v11  ;;  %3964 = vmatpush3.bf16.msra.mxu1 %v5075_v53  ;;  %v253_v10 = vld [vmem:[%s5654_s3 + $0x48] sm:$0xff]  ;;  %v270_v13 = vld [vmem:[%s5654_s3 + $0xd0] sm:$0xff]  ;;  %v271_v14 = vld [vmem:[%s5654_s3 + $0xd8] sm:$0xff] }
  0x47   : > { %401 = vmatprep.mubr.f32.mxu0 %v4672_v0  ;;  %3966 = vmatprep.subr.bf16.mxu1 %v5087_v57  ;;  %v5147_v15 = vpack.c.bf16 %v271_v14, %v270_v13  ;;  %v254_v16 = vld [vmem:[%s5654_s3 + $0x50] sm:$0xff]  ;;  %v255_v17 = vld [vmem:[%s5654_s3 + $0x58] sm:$0xff]  ;;  %v272_v21 = vld [vmem:[%s5654_s3 + $0xe0] sm:$0xff] }
  0x48   : > { %v5155_v18 = vpack.c.bf16 %v255_v17, %v254_v16  ;;  %v256_v25 = vld [vmem:[%s5654_s3 + $0x60] sm:$0xff]  ;;  %v257_v26 = vld [vmem:[%s5654_s3 + $0x68] sm:$0xff] }
  0x49   : > { %655 = vrot.lane.b32.xlu0 %v4870_v22, %s4673_s26  ;;  %657 = vrot.lane.b32.xlu1 %v4876_v24, %s4673_s26  ;;  %v5175_v27 = vpack.c.bf16 %v257_v26, %v256_v25 }
  0x4a   : > { %3436 = vmatmul.mubr.msk.f32.gmra.mrb[4].mxu0 %vm300_vm0, %v4838_v8  ;;  %3968 = vmatpush3.bf16.msra.mxu1 %v5095_v60 }
  0x4b   : > { %407 = vmatprep.mubr.f32.mxu0 %v4672_v0  ;;  %3970 = vmatprep.subr.bf16.mxu1 %v5107_v1 }
  0x4d   : > { %659 = vrot.lane.b32.xlu0 %v4887_v29, %s4673_s26  ;;  %661 = vrot.lane.b32.xlu1 %v4891_v30, %s4673_s26 }
  0x4e   : > { %3437 = vmatmul.mubr.msk.f32.gmra.mrb[6].mxu0 %vm300_vm0, %v4848_v12 }
  0x4f   : > { %413 = vmatprep.mubr.f32.mxu0 %v4672_v0 }
  0x51   : > { %1034 = vrot.lane.b32.xlu0 %v4833_v4, %s4674_s22  ;;  %1036 = vrot.lane.b32.xlu1 %v4844_v11, %s4674_s22 }
  0x52   : > { %3438 = vmatmul.mubr.msk.f32.gmra.mrb[8].mxu0 %vm300_vm0, %v4870_v22 }
  0x53   : > { %419 = vmatprep.mubr.f32.mxu0 %v4672_v0 }
  0x55   : > { %1038 = vrot.lane.b32.xlu0 %v4838_v8, %s4674_s22  ;;  %1040 = vrot.lane.b32.xlu1 %v4848_v12, %s4674_s22 }
  0x56   : > { %3439 = vmatmul.mubr.msk.f32.gmra.mrb[10].mxu0 %vm300_vm0, %v4876_v24 }
  0x57   : > { %425 = vmatprep.mubr.f32.mxu0 %v4672_v0 }
  0x59   : > { %1042 = vrot.lane.b32.xlu0 %v4870_v22, %s4674_s22  ;;  %1044 = vrot.lane.b32.xlu1 %v4876_v24, %s4674_s22 }
  0x5a   : > { %3440 = vmatmul.mubr.msk.f32.gmra.mrb[12].mxu0 %vm300_vm0, %v4887_v29 }
  0x5b   : > { %431 = vmatprep.mubr.f32.mxu0 %v4672_v0 }
  0x5d   : > { %1046 = vrot.lane.b32.xlu0 %v4887_v29, %s4674_s22  ;;  %1048 = vrot.lane.b32.xlu1 %v4891_v30, %s4674_s22 }
  0x5e   : > { %3441 = vmatmul.mubr.msk.f32.gmra.mrb[14].mxu0 %vm300_vm0, %v4891_v30 }
  0x5f   : > { %743 = vmatprep.mubr.f32.mxu0 %v4672_v0 }
  0x61   : > { %1421 = vrot.lane.b32.xlu0 %v4833_v4, %s4675_s8  ;;  %1423 = vrot.lane.b32.xlu1 %v4844_v11, %s4675_s8 }
  0x65   : > { %1425 = vrot.lane.b32.xlu0 %v4838_v8, %s4675_s8  ;;  %1427 = vrot.lane.b32.xlu1 %v4848_v12, %s4675_s8 }
  0x69   : > { %1429 = vrot.lane.b32.xlu0 %v4870_v22, %s4675_s8  ;;  %1431 = vrot.lane.b32.xlu1 %v4876_v24, %s4675_s8 }
  0x6d   : > { %1433 = vrot.lane.b32.xlu0 %v4887_v29, %s4675_s8  ;;  %1435 = vrot.lane.b32.xlu1 %v4891_v30, %s4675_s8 }
  0x71   : > { %1808 = vrot.lane.b32.xlu0 %v4833_v4, %s4676_s10  ;;  %1810 = vrot.lane.b32.xlu1 %v4844_v11, %s4676_s10 }
  0x75   : > { %1812 = vrot.lane.b32.xlu0 %v4838_v8, %s4676_s10  ;;  %1814 = vrot.lane.b32.xlu1 %v4848_v12, %s4676_s10 }
  0x79   : > { %1816 = vrot.lane.b32.xlu0 %v4870_v22, %s4676_s10  ;;  %1818 = vrot.lane.b32.xlu1 %v4876_v24, %s4676_s10 }
  0x7d   : > { %1820 = vrot.lane.b32.xlu0 %v4887_v29, %s4676_s10  ;;  %1822 = vrot.lane.b32.xlu1 %v4891_v30, %s4676_s10 }
  0x81   : > { %2195 = vrot.lane.b32.xlu0 %v4833_v4, %s4677_s11  ;;  %2197 = vrot.lane.b32.xlu1 %v4844_v11, %s4677_s11 }
  0x85   : > { %2199 = vrot.lane.b32.xlu0 %v4838_v8, %s4677_s11  ;;  %2201 = vrot.lane.b32.xlu1 %v4848_v12, %s4677_s11 }
  0x89   : > { %2203 = vrot.lane.b32.xlu0 %v4870_v22, %s4677_s11  ;;  %2205 = vrot.lane.b32.xlu1 %v4876_v24, %s4677_s11 }
  0x8d   : > { %2207 = vrot.lane.b32.xlu0 %v4887_v29, %s4677_s11  ;;  %2209 = vrot.lane.b32.xlu1 %v4891_v30, %s4677_s11 }
  0x91   : > { %2582 = vrot.lane.b32.xlu0 %v4833_v4, %s4678_s12  ;;  %2584 = vrot.lane.b32.xlu1 %v4844_v11, %s4678_s12 }
  0x95   : > { %2586 = vrot.lane.b32.xlu0 %v4838_v8, %s4678_s12  ;;  %2588 = vrot.lane.b32.xlu1 %v4848_v12, %s4678_s12 }
  0x99   : > { %2590 = vrot.lane.b32.xlu0 %v4870_v22, %s4678_s12  ;;  %2592 = vrot.lane.b32.xlu1 %v4876_v24, %s4678_s12 }
  0x9d   : > { %2594 = vrot.lane.b32.xlu0 %v4887_v29, %s4678_s12  ;;  %2596 = vrot.lane.b32.xlu1 %v4891_v30, %s4678_s12 }
  0xa1   : > { %2969 = vrot.lane.b32.xlu0 %v4833_v4, %s4679_s23  ;;  %2971 = vrot.lane.b32.xlu1 %v4844_v11, %s4679_s23  ;;  %v5115_v4 = vpack.c.bf16 %v251_v3, %v250_v2  ;;  %v5135_v11 = vpack.c.bf16 %v253_v10, %v252_v9 }
  0xa3   : > { %3972 = vmatpush3.bf16.msra.mxu1 %v5115_v4 }
  0xa5   : > { %2973 = vrot.lane.b32.xlu0 %v4838_v8, %s4679_s23  ;;  %2975 = vrot.lane.b32.xlu1 %v4848_v12, %s4679_s23  ;;  %v5127_v8 = vpack.c.bf16 %v269_v7, %v268_v6 }
  0xa7   : > { %3974 = vmatprep.subr.bf16.mxu1 %v5127_v8 }
  0xa8   : > { %3976 = vmatpush3.bf16.msra.mxu1 %v5135_v11 }
  0xa9   : > { %2977 = vrot.lane.b32.xlu0 %v4870_v22, %s4679_s23  ;;  %2979 = vrot.lane.b32.xlu1 %v4876_v24, %s4679_s23  ;;  %v273_v22 = vld [vmem:[%s5654_s3 + $0xe8] sm:$0xff] }
  0xaa   : > { %3978 = vmatprep.subr.bf16.mxu1 %v5147_v15  ;;  %v5167_v24 = vpack.c.bf16 %v273_v22, %v272_v21 }
  0xac   : > { %3980 = vmatpush3.bf16.msra.mxu1 %v5155_v18 }
  0xad   : > { %2981 = vrot.lane.b32.xlu0 %v4887_v29, %s4679_s23  ;;  %2983 = vrot.lane.b32.xlu1 %v4891_v30, %s4679_s23  ;;  %v274_v29 = vld [vmem:[%s5654_s3 + $0xf0] sm:$0xff]  ;;  %v275_v30 = vld [vmem:[%s5654_s3 + $0xf8] sm:$0xff] }
  0xae   : > { %3982 = vmatprep.subr.bf16.mxu1 %v5167_v24 }
  0xb0   : > { %3984 = vmatpush3.bf16.msra.mxu1 %v5175_v27 }
  0xb3   : > { %v648_v31 = vpop.permute.xlu0 %647  ;;  %v652_v33 = vpop.permute.xlu1 %651 }
  0xb4   : > { %3442 = vmatmul.mubr.msk.f32.vlgmr.msra.gmra.mrb[16].mxu0 %vm300_vm0, %v648_v31  ;;  %v5187_v31 = vpack.c.bf16 %v275_v30, %v274_v29 }
  0xb5   : > { %4028 = vmatpush1.bf16.msra.mxu0 %v4872_v23  ;;  %749 = vmatprep.mubr.f32.mxu0 %v4672_v0 }
  0xb6   : > { %4062 = vmatprep.subr.bf16.mxu0 %v4860_v19  ;;  %3986 = vmatprep.subr.bf16.mxu1 %v5187_v31 }
  0xb7   : > { %v650_v32 = vpop.permute.xlu0 %649  ;;  %v654_v34 = vpop.permute.xlu1 %653 }
  0xb8   : > { %3443 = vmatmul.mubr.msk.f32.gmra.mrb[18].mxu0 %vm300_vm0, %v650_v32  ;;  %v258_v32 = vld [vmem:[%s5654_s3 + $0x70] sm:$0xff] }
  0xb9   : > { %755 = vmatprep.mubr.f32.mxu0 %v4672_v0 }
  0xbb   : > { %v656_v35 = vpop.permute.xlu0 %655  ;;  %v658_v36 = vpop.permute.xlu1 %657 }
  0xbc   : > { %3444 = vmatmul.mubr.msk.f32.gmra.mrb[20].mxu0 %vm300_vm0, %v652_v33  ;;  %v259_v33 = vld [vmem:[%s5654_s3 + $0x78] sm:$0xff] }
  0xbd   : > { %761 = vmatprep.mubr.f32.mxu0 %v4672_v0 }
  0xbf   : > { %v660_v37 = vpop.permute.xlu0 %659  ;;  %v662_v38 = vpop.permute.xlu1 %661 }
  0xc0   : > { %3445 = vmatmul.mubr.msk.f32.gmra.mrb[22].mxu0 %vm300_vm0, %v654_v34  ;;  %v5195_v34 = vpack.c.bf16 %v259_v33, %v258_v32 }
  0xc1   : > { %767 = vmatprep.mubr.f32.mxu0 %v4672_v0 }
  0xc2   : > { %3988 = vmatpush3.bf16.msra.mxu1 %v5195_v34 }
  0xc3   : > { %v1035_v39 = vpop.permute.xlu0 %1034  ;;  %v1037_v40 = vpop.permute.xlu1 %1036  ;;  %3994 = vmatprep.subr.bf16.mxu1 %v5047_v43 }
  0xc4   : > { %3446 = vmatmul.mubr.msk.f32.gmra.mrb[24].mxu0 %vm300_vm0, %v656_v35 }
  0xc5   : > { %773 = vmatprep.mubr.f32.mxu0 %v4672_v0 }
  0xc7   : > { %v1039_v47 = vpop.permute.xlu0 %1038  ;;  %v1041_v54 = vpop.permute.xlu1 %1040 }
  0xc8   : > { %3447 = vmatmul.mubr.msk.f32.gmra.mrb[26].mxu0 %vm300_vm0, %v658_v36 }
  0xc9   : > { %779 = vmatprep.mubr.f32.mxu0 %v4672_v0 }
  0xcb   : > { %v1043_v61 = vpop.permute.xlu0 %1042  ;;  %v1045_v5 = vpop.permute.xlu1 %1044 }
  0xcc   : > { %3448 = vmatmul.mubr.msk.f32.gmra.mrb[28].mxu0 %vm300_vm0, %v660_v37 }
  0xcd   : > { %785 = vmatprep.mubr.f32.mxu0 %v4672_v0 }
  0xcf   : > { %v1047_v12 = vpop.permute.xlu0 %1046  ;;  %v1049_v20 = vpop.permute.xlu1 %1048 }
  0xd0   : > { %3449 = vmatmul.mubr.msk.f32.gmra.mrb[30].mxu0 %vm300_vm0, %v662_v38 }
  0xd1   : > { %1130 = vmatprep.mubr.f32.mxu0 %v4672_v0 }
  0xd3   : > { %v1422_v28 = vpop.permute.xlu0 %1421  ;;  %v1424_v35 = vpop.permute.xlu1 %1423 }
  0xd4   : > { %3450 = vmatmul.mubr.msk.f32.vlgmr.msra.gmra.mrb[32].mxu0 %vm300_vm0, %v1035_v39 }
  0xd5   : > { %4064 = vmatpush1.bf16.msra.mxu0 %v4872_v23  ;;  %1136 = vmatprep.mubr.f32.mxu0 %v4672_v0 }
  0xd6   : > { %4098 = vmatprep.subr.bf16.mxu0 %v4860_v19 }
  0xd7   : > { %v1426_v36 = vpop.permute.xlu0 %1425  ;;  %v1428_v37 = vpop.permute.xlu1 %1427 }
  0xd8   : > { %3451 = vmatmul.mubr.msk.f32.gmra.mrb[34].mxu0 %vm300_vm0, %v1037_v40 }
  0xd9   : > { %1142 = vmatprep.mubr.f32.mxu0 %v4672_v0 }
  0xdb   : > { %v1430_v38 = vpop.permute.xlu0 %1429  ;;  %v1432_v39 = vpop.permute.xlu1 %1431 }
  0xdc   : > { %3452 = vmatmul.mubr.msk.f32.gmra.mrb[36].mxu0 %vm300_vm0, %v1039_v47 }
  0xdd   : > { %1148 = vmatprep.mubr.f32.mxu0 %v4672_v0 }
  0xdf   : > { %v1434_v40 = vpop.permute.xlu0 %1433  ;;  %v1436_v41 = vpop.permute.xlu1 %1435 }
  0xe0   : > { %3453 = vmatmul.mubr.msk.f32.gmra.mrb[38].mxu0 %vm300_vm0, %v1041_v54 }
  0xe1   : > { %1154 = vmatprep.mubr.f32.mxu0 %v4672_v0 }
  0xe3   : > { %v1809_v42 = vpop.permute.xlu0 %1808  ;;  %v1811_v44 = vpop.permute.xlu1 %1810 }
  0xe4   : > { %3454 = vmatmul.mubr.msk.f32.gmra.mrb[40].mxu0 %vm300_vm0, %v1043_v61 }
  0xe5   : > { %1160 = vmatprep.mubr.f32.mxu0 %v4672_v0 }
  0xe7   : > { %v1813_v45 = vpop.permute.xlu0 %1812  ;;  %v1815_v47 = vpop.permute.xlu1 %1814 }
  0xe8   : > { %3455 = vmatmul.mubr.msk.f32.gmra.mrb[42].mxu0 %vm300_vm0, %v1045_v5 }
  0xe9   : > { %1166 = vmatprep.mubr.f32.mxu0 %v4672_v0 }
  0xeb   : > { %v1817_v54 = vpop.permute.xlu0 %1816  ;;  %v1819_v61 = vpop.permute.xlu1 %1818 }
  0xec   : > { %3456 = vmatmul.mubr.msk.f32.gmra.mrb[44].mxu0 %vm300_vm0, %v1047_v12 }
  0xed   : > { %1172 = vmatprep.mubr.f32.mxu0 %v4672_v0 }
  0xef   : > { %v1821_v5 = vpop.permute.xlu0 %1820  ;;  %v1823_v17 = vpop.permute.xlu1 %1822 }
  0xf0   : > { %3457 = vmatmul.mubr.msk.f32.gmra.mrb[46].mxu0 %vm300_vm0, %v1049_v20 }
  0xf1   : > { %1517 = vmatprep.mubr.f32.mxu0 %v4672_v0 }
  0xf4   : > { %3458 = vmatmul.mubr.msk.f32.vlgmr.msra.gmra.mrb[48].mxu0 %vm300_vm0, %v1422_v28 }
  0xf5   : > { %4100 = vmatpush1.bf16.msra.mxu0 %v4872_v23  ;;  %1523 = vmatprep.mubr.f32.mxu0 %v4672_v0 }
  0xf6   : > { %4134 = vmatprep.subr.bf16.mxu0 %v4860_v19 }
  0xf8   : > { %3459 = vmatmul.mubr.msk.f32.gmra.mrb[50].mxu0 %vm300_vm0, %v1424_v35  ;;  %v2196_v35 = vpop.permute.xlu0 %2195 }
  0xf9   : > { %1529 = vmatprep.mubr.f32.mxu0 %v4672_v0 }
  0xfc   : > { %3460 = vmatmul.mubr.msk.f32.gmra.mrb[52].mxu0 %vm300_vm0, %v1426_v36 }
  0xfd   : > { %1535 = vmatprep.mubr.f32.mxu0 %v4672_v0 }
 0x100   : > { %3461 = vmatmul.mubr.msk.f32.gmra.mrb[54].mxu0 %vm300_vm0, %v1428_v37 }
 0x101   : > { %1541 = vmatprep.mubr.f32.mxu0 %v4672_v0 }
 0x104   : > { %3462 = vmatmul.mubr.msk.f32.gmra.mrb[56].mxu0 %vm300_vm0, %v1430_v38 }
 0x105   : > { %1547 = vmatprep.mubr.f32.mxu0 %v4672_v0 }
 0x108   : > { %3463 = vmatmul.mubr.msk.f32.gmra.mrb[58].mxu0 %vm300_vm0, %v1432_v39 }
 0x109   : > { %1553 = vmatprep.mubr.f32.mxu0 %v4672_v0 }
 0x10c   : > { %3464 = vmatmul.mubr.msk.f32.gmra.mrb[60].mxu0 %vm300_vm0, %v1434_v40 }
 0x10d   : > { %1559 = vmatprep.mubr.f32.mxu0 %v4672_v0 }
 0x110   : > { %3465 = vmatmul.mubr.msk.f32.gmra.mrb[62].mxu0 %vm300_vm0, %v1436_v41 }
 0x111   : > { %1904 = vmatprep.mubr.f32.mxu0 %v4672_v0 }
 0x114   : > { %3466 = vmatmul.mubr.msk.f32.vlgmr.msra.gmra.mrb[64].mxu0 %vm300_vm0, %v1809_v42 }
 0x115   : > { %4136 = vmatpush1.bf16.msra.mxu0 %v4872_v23  ;;  %1910 = vmatprep.mubr.f32.mxu0 %v4672_v0  ;;  %v391_v48 = vpop.f32.mrb[0].mxu0 }
 0x116   : > { %4170 = vmatprep.subr.bf16.mxu0 %v4860_v19  ;;  %v438_v49 = vmul.f32 0.5, %v391_v48  ;;  %v393_v51 = vpop.f32.mrb[1].mxu0  ;;  %v2198_v48 = vpop.permute.xlu1 %2197 }
 0x117   : > { %v439_v52 = vmul.f32 0.5, %v393_v51 }
 0x118   : > { %3467 = vmatmul.mubr.msk.f32.gmra.mrb[66].mxu0 %vm300_vm0, %v1811_v44  ;;  %4315 = vtanh.f32 %v438_v49 }
 0x119   : > { %1916 = vmatprep.mubr.f32.mxu0 %v4672_v0  ;;  %4317 = vtanh.f32 %v439_v52  ;;  %v397_v55 = vpop.f32.mrb[2].mxu0 }
 0x11a   : > { %v440_v56 = vmul.f32 0.5, %v397_v55  ;;  %v399_v58 = vpop.f32.mrb[3].mxu0 }
 0x11b   : > { %v441_v59 = vmul.f32 0.5, %v399_v58 }
 0x11c   : > { %3468 = vmatmul.mubr.msk.f32.gmra.mrb[68].mxu0 %vm300_vm0, %v1813_v45  ;;  %4319 = vtanh.f32 %v440_v56 }
 0x11d   : > { %1922 = vmatprep.mubr.f32.mxu0 %v4672_v0  ;;  %4321 = vtanh.f32 %v441_v59  ;;  %v403_v62 = vpop.f32.mrb[4].mxu0 }
 0x11e   : > { %v442_v63 = vmul.f32 0.5, %v403_v62  ;;  %v405_v2 = vpop.f32.mrb[5].mxu0 }
 0x11f   : > { %v443_v3 = vmul.f32 0.5, %v405_v2 }
 0x120   : > { %3469 = vmatmul.mubr.msk.f32.gmra.mrb[70].mxu0 %vm300_vm0, %v1815_v47  ;;  %4323 = vtanh.f32 %v442_v63  ;;  %v2200_v63 = vpop.permute.xlu0 %2199 }
 0x121   : > { %1928 = vmatprep.mubr.f32.mxu0 %v4672_v0  ;;  %4325 = vtanh.f32 %v443_v3  ;;  %v409_v6 = vpop.f32.mrb[6].mxu0 }
 0x122   : > { %v4316_v7 = vpop.eup %4315  ;;  %v444_v9 = vmul.f32 0.5, %v409_v6  ;;  %v411_v10 = vpop.f32.mrb[7].mxu0 }
 0x123   : > { %v4318_v12 = vpop.eup %4317  ;;  %v470_v13 = vmul.f32 0.5, %v4316_v7  ;;  %v445_v14 = vmul.f32 0.5, %v411_v10 }
 0x124   : > { %3470 = vmatmul.mubr.msk.f32.gmra.mrb[72].mxu0 %vm300_vm0, %v1817_v54  ;;  %4327 = vtanh.f32 %v444_v9  ;;  %v471_v16 = vmul.f32 0.5, %v4318_v12 }
 0x125   : > { %1934 = vmatprep.mubr.f32.mxu0 %v4672_v0  ;;  %4329 = vtanh.f32 %v445_v14  ;;  %v415_v20 = vpop.f32.mrb[8].mxu0  ;;  %v486_v21 = vadd.f32 0.5, %v470_v13  ;;  %v2202_v14 = vpop.permute.xlu1 %2201 }
 0x126   : > { %v4320_v22 = vpop.eup %4319  ;;  %v446_v25 = vmul.f32 0.5, %v415_v20  ;;  %v417_v26 = vpop.f32.mrb[9].mxu0  ;;  %v487_v28 = vadd.f32 0.5, %v471_v16 }
 0x127   : > { %v4322_v29 = vpop.eup %4321  ;;  %v472_v30 = vmul.f32 0.5, %v4320_v22  ;;  %v447_v32 = vmul.f32 0.5, %v417_v26  ;;  %v2204_v26 = vpop.permute.xlu0 %2203 }
 0x128   : > { %3471 = vmatmul.mubr.msk.f32.gmra.mrb[74].mxu0 %vm300_vm0, %v1819_v61  ;;  %v473_v33 = vmul.f32 0.5, %v4322_v29  ;;  %4331 = vtanh.f32 %v446_v25  ;;  %566 = vmatprep.mubr.f32.mxu1 %v487_v28 }
 0x129   : > { %1940 = vmatprep.mubr.f32.mxu0 %v4672_v0  ;;  %4333 = vtanh.f32 %v447_v32  ;;  %v421_v36 = vpop.f32.mrb[10].mxu0  ;;  %567 = vmatmul.mubr.f32.vlgmr.msra.gmra.mrb[0].mxu1 %v486_v21  ;;  %v488_v41 = vadd.f32 0.5, %v472_v30 }
 0x12a   : > { %v4324_v37 = vpop.eup %4323  ;;  %v448_v38 = vmul.f32 0.5, %v421_v36  ;;  %v423_v39 = vpop.f32.mrb[11].mxu0  ;;  %v489_v40 = vadd.f32 0.5, %v473_v33  ;;  %3996 = vmatpush3.bf16.msra.mxu1 %v5055_v46 }
 0x12b   : > { %v4326_v42 = vpop.eup %4325  ;;  %v474_v44 = vmul.f32 0.5, %v4324_v37  ;;  %v449_v45 = vmul.f32 0.5, %v423_v39  ;;  %3998 = vmatprep.subr.bf16.mxu1 %v5067_v50  ;;  %v2206_v36 = vpop.permute.xlu1 %2205 }
 0x12c   : > { %3472 = vmatmul.mubr.msk.f32.gmra.mrb[76].mxu0 %vm300_vm0, %v1821_v5  ;;  %v475_v47 = vmul.f32 0.5, %v4326_v42  ;;  %4335 = vtanh.f32 %v448_v38  ;;  %571 = vmatprep.mubr.f32.mxu1 %v489_v40 }
 0x12d   : > { %1946 = vmatprep.mubr.f32.mxu0 %v4672_v0  ;;  %4337 = vtanh.f32 %v449_v45  ;;  %v427_v49 = vpop.f32.mrb[12].mxu0  ;;  %572 = vmatmul.mubr.f32.gmra.mrb[2].mxu1 %v488_v41  ;;  %v490_v56 = vadd.f32 0.5, %v474_v44  ;;  %v2208_v44 = vpop.permute.xlu0 %2207 }
 0x12e   : > { %v4328_v51 = vpop.eup %4327  ;;  %v450_v52 = vmul.f32 0.5, %v427_v49  ;;  %v429_v54 = vpop.f32.mrb[13].mxu0  ;;  %v491_v55 = vadd.f32 0.5, %v475_v47  ;;  %4000 = vmatpush3.bf16.msra.mxu1 %v5075_v53 }
 0x12f   : > { %v4330_v58 = vpop.eup %4329  ;;  %v476_v59 = vmul.f32 0.5, %v4328_v51  ;;  %v451_v61 = vmul.f32 0.5, %v429_v54  ;;  %4002 = vmatprep.subr.bf16.mxu1 %v5087_v57 }
 0x130   : > { %3473 = vmatmul.mubr.msk.f32.gmra.mrb[78].mxu0 %vm300_vm0, %v1823_v17  ;;  %v477_v62 = vmul.f32 0.5, %v4330_v58  ;;  %4339 = vtanh.f32 %v450_v52  ;;  %576 = vmatprep.mubr.f32.mxu1 %v491_v55 }
 0x131   : > { %2291 = vmatprep.mubr.f32.mxu0 %v4672_v0  ;;  %4341 = vtanh.f32 %v451_v61  ;;  %577 = vmatmul.mubr.f32.gmra.mrb[4].mxu1 %v490_v56  ;;  %v492_v7 = vadd.f32 0.5, %v476_v59  ;;  %v2583_v49 = vpop.permute.xlu0 %2582 }
 0x132   : > { %v4332_v2 = vpop.eup %4331  ;;  %v493_v6 = vadd.f32 0.5, %v477_v62  ;;  %4004 = vmatpush3.bf16.msra.mxu1 %v5095_v60 }
 0x133   : > { %v4334_v9 = vpop.eup %4333  ;;  %v478_v10 = vmul.f32 0.5, %v4332_v2  ;;  %4006 = vmatprep.subr.bf16.mxu1 %v5107_v1 }
 0x134   : > { %3474 = vmatmul.mubr.msk.f32.vlgmr.msra.gmra.mrb[80].mxu0 %vm300_vm0, %v2196_v35  ;;  %v479_v13 = vmul.f32 0.5, %v4334_v9  ;;  %581 = vmatprep.mubr.f32.mxu1 %v493_v6 }
 0x135   : > { %4172 = vmatpush1.bf16.msra.mxu0 %v4872_v23  ;;  %2297 = vmatprep.mubr.f32.mxu0 %v4672_v0  ;;  %v494_v20 = vadd.f32 0.5, %v478_v10  ;;  %v2587_v52 = vpop.permute.xlu0 %2586 }
 0x136   : > { %4206 = vmatprep.subr.bf16.mxu0 %v4860_v19  ;;  %v433_v19 = vpop.f32.mrb[14].mxu0  ;;  %v4336_v16 = vpop.eup %4335  ;;  %582 = vmatmul.mubr.f32.gmra.mrb[6].mxu1 %v492_v7  ;;  %v495_v17 = vadd.f32 0.5, %v479_v13 }
 0x137   : > { %v452_v3 = vmul.f32 0.5, %v433_v19  ;;  %v435_v5 = vpop.f32.mrb[15].mxu0  ;;  %v4338_v21 = vpop.eup %4337  ;;  %v480_v22 = vmul.f32 0.5, %v4336_v16  ;;  %4008 = vmatpush3.bf16.msra.mxu1 %v5115_v4 }
 0x138   : > { %3475 = vmatmul.mubr.msk.f32.gmra.mrb[82].mxu0 %vm300_vm0, %v2198_v48  ;;  %v453_v12 = vmul.f32 0.5, %v435_v5  ;;  %v481_v25 = vmul.f32 0.5, %v4338_v21  ;;  %586 = vmatprep.mubr.f32.mxu1 %v495_v17  ;;  %v2210_v48 = vpop.permute.xlu1 %2209 }
 0x139   : > { %2303 = vmatprep.mubr.f32.mxu0 %v4672_v0  ;;  %4343 = vtanh.f32 %v452_v3  ;;  %4010 = vmatprep.subr.bf16.mxu1 %v5127_v8  ;;  %v496_v30 = vadd.f32 0.5, %v480_v22  ;;  %v2591_v55 = vpop.permute.xlu0 %2590 }
 0x13a   : > { %4345 = vtanh.f32 %v453_v12  ;;  %v4340_v28 = vpop.eup %4339  ;;  %587 = vmatmul.mubr.f32.gmra.mrb[8].mxu1 %v494_v20  ;;  %v497_v29 = vadd.f32 0.5, %v481_v25 }
 0x13b   : > { %v4342_v32 = vpop.eup %4341  ;;  %v482_v33 = vmul.f32 0.5, %v4340_v28  ;;  %4012 = vmatpush3.bf16.msra.mxu1 %v5135_v11 }
 0x13c   : > { %3476 = vmatmul.mubr.msk.f32.gmra.mrb[84].mxu0 %vm300_vm0, %v2200_v63  ;;  %v483_v35 = vmul.f32 0.5, %v4342_v32  ;;  %591 = vmatprep.mubr.f32.mxu1 %v497_v29  ;;  %v2585_v51 = vpop.permute.xlu1 %2584 }
 0x13d   : > { %2309 = vmatprep.mubr.f32.mxu0 %v4672_v0  ;;  %4014 = vmatprep.subr.bf16.mxu1 %v5147_v15  ;;  %v498_v39 = vadd.f32 0.5, %v482_v33  ;;  %v2595_v56 = vpop.permute.xlu0 %2594 }
 0x13e   : > { %592 = vmatmul.mubr.f32.gmra.mrb[10].mxu1 %v496_v30  ;;  %v499_v38 = vadd.f32 0.5, %v483_v35 }
 0x13f   : > { %4016 = vmatpush3.bf16.msra.mxu1 %v5155_v18 }
 0x140   : > { %3477 = vmatmul.mubr.msk.f32.gmra.mrb[86].mxu0 %vm300_vm0, %v2202_v14  ;;  %596 = vmatprep.mubr.f32.mxu1 %v499_v38  ;;  %v2589_v54 = vpop.permute.xlu1 %2588 }
 0x141   : > { %2315 = vmatprep.mubr.f32.mxu0 %v4672_v0  ;;  %4018 = vmatprep.subr.bf16.mxu1 %v5167_v24  ;;  %v2970_v59 = vpop.permute.xlu0 %2969 }
 0x142   : > { %597 = vmatmul.mubr.f32.gmra.mrb[12].mxu1 %v498_v39 }
 0x143   : > { %v4344_v37 = vpop.eup %4343  ;;  %4020 = vmatpush3.bf16.msra.mxu1 %v5175_v27 }
 0x144   : > { %3478 = vmatmul.mubr.msk.f32.gmra.mrb[88].mxu0 %vm300_vm0, %v2204_v26  ;;  %v4346_v40 = vpop.eup %4345  ;;  %v484_v41 = vmul.f32 0.5, %v4344_v37  ;;  %4022 = vmatprep.subr.bf16.mxu1 %v5187_v31 }
 0x145   : > { %2321 = vmatprep.mubr.f32.mxu0 %v4672_v0  ;;  %v485_v42 = vmul.f32 0.5, %v4346_v40  ;;  %v2974_v62 = vpop.permute.xlu0 %2973 }
 0x146   : > { %v500_v47 = vadd.f32 0.5, %v484_v41 }
 0x147   : > { %v501_v45 = vadd.f32 0.5, %v485_v42  ;;  %4024 = vmatpush3.bf16.msra.mxu1 %v5195_v34 }
 0x148   : > { %3479 = vmatmul.mubr.msk.f32.gmra.mrb[90].mxu0 %vm300_vm0, %v2206_v36  ;;  %4030 = vmatprep.subr.bf16.mxu1 %v5047_v43 }
 0x149   : > { %2327 = vmatprep.mubr.f32.mxu0 %v4672_v0  ;;  %601 = vmatprep.mubr.f32.mxu1 %v501_v45  ;;  %v2978_v19 = vpop.permute.xlu0 %2977 }
 0x14a   : > { %602 = vmatmul.mubr.f32.gmra.mrb[14].mxu1 %v500_v47 }
 0x14c   : > { %3480 = vmatmul.mubr.msk.f32.gmra.mrb[92].mxu0 %vm300_vm0, %v2208_v44 }
 0x14d   : > { %2333 = vmatprep.mubr.f32.mxu0 %v4672_v0  ;;  %v2982_v9 = vpop.permute.xlu0 %2981 }
 0x150   : > { %3481 = vmatmul.mubr.msk.f32.gmra.mrb[94].mxu0 %vm300_vm0, %v2210_v48 }
 0x151   : > { %2678 = vmatprep.mubr.f32.mxu0 %v4672_v0 }
 0x154   : > { %3482 = vmatmul.mubr.msk.f32.vlgmr.msra.gmra.mrb[96].mxu0 %vm300_vm0, %v2583_v49 }
 0x155   : > { %4208 = vmatpush1.bf16.msra.mxu0 %v4872_v23  ;;  %2684 = vmatprep.mubr.f32.mxu0 %v4672_v0  ;;  %v2593_v23 = vpop.permute.xlu1 %2592 }
 0x156   : > { %4210 = vmatprep.subr.bf16.mxu0 %v5047_v43 }
 0x158   : > { %3483 = vmatmul.mubr.msk.f32.gmra.mrb[98].mxu0 %vm300_vm0, %v2585_v51 }
 0x159   : > { %2690 = vmatprep.mubr.f32.mxu0 %v4672_v0  ;;  %v2597_v58 = vpop.permute.xlu1 %2596 }
 0x15c   : > { %3484 = vmatmul.mubr.msk.f32.gmra.mrb[100].mxu0 %vm300_vm0, %v2587_v52 }
 0x15d   : > { %2696 = vmatprep.mubr.f32.mxu0 %v4672_v0  ;;  %v2972_v61 = vpop.permute.xlu1 %2971 }
 0x160   : > { %3485 = vmatmul.mubr.msk.f32.gmra.mrb[102].mxu0 %vm300_vm0, %v2589_v54 }
 0x161   : > { %2702 = vmatprep.mubr.f32.mxu0 %v4672_v0  ;;  %v2976_v63 = vpop.permute.xlu1 %2975 }
 0x164   : > { %3486 = vmatmul.mubr.msk.f32.gmra.mrb[104].mxu0 %vm300_vm0, %v2591_v55 }
 0x165   : > { %2708 = vmatprep.mubr.f32.mxu0 %v4672_v0  ;;  %v2980_v2 = vpop.permute.xlu1 %2979 }
 0x168   : > { %3487 = vmatmul.mubr.msk.f32.gmra.mrb[106].mxu0 %vm300_vm0, %v2593_v23 }
 0x169   : > { %2714 = vmatprep.mubr.f32.mxu0 %v4672_v0  ;;  %v2984_v16 = vpop.permute.xlu1 %2983 }
 0x16c   : > { %3488 = vmatmul.mubr.msk.f32.gmra.mrb[108].mxu0 %vm300_vm0, %v2595_v56 }
 0x16d   : > { %2720 = vmatprep.mubr.f32.mxu0 %v4672_v0 }
 0x170   : > { %3489 = vmatmul.mubr.msk.f32.gmra.mrb[110].mxu0 %vm300_vm0, %v2597_v58 }
 0x171   : > { %3065 = vmatprep.mubr.f32.mxu0 %v4672_v0 }
 0x174   : > { %3490 = vmatmul.mubr.msk.f32.vlgmr.msra.gmra.mrb[112].mxu0 %vm300_vm0, %v2970_v59 }
 0x175   : > { %3071 = vmatprep.mubr.f32.mxu0 %v4672_v0  ;;  %4212 = vmatpush3.bf16.msra.mxu0 %v5055_v46 }
 0x176   : > { %4214 = vmatprep.subr.bf16.mxu0 %v5067_v50 }
 0x178   : > { %3491 = vmatmul.mubr.msk.f32.gmra.mrb[114].mxu0 %vm300_vm0, %v2972_v61 }
 0x179   : > { %3077 = vmatprep.mubr.f32.mxu0 %v4672_v0  ;;  %4216 = vmatpush3.bf16.msra.mxu0 %v5075_v53 }
 0x17a   : > { %4218 = vmatprep.subr.bf16.mxu0 %v5087_v57 }
 0x17c   : > { %3492 = vmatmul.mubr.msk.f32.gmra.mrb[116].mxu0 %vm300_vm0, %v2974_v62 }
 0x17d   : > { %3083 = vmatprep.mubr.f32.mxu0 %v4672_v0  ;;  %4220 = vmatpush3.bf16.msra.mxu0 %v5095_v60 }
 0x17e   : > { %4222 = vmatprep.subr.bf16.mxu0 %v5107_v1 }
 0x180   : > { %3493 = vmatmul.mubr.msk.f32.gmra.mrb[118].mxu0 %vm300_vm0, %v2976_v63 }
 0x181   : > { %3089 = vmatprep.mubr.f32.mxu0 %v4672_v0  ;;  %4224 = vmatpush3.bf16.msra.mxu0 %v5115_v4 }
 0x182   : > { %4226 = vmatprep.subr.bf16.mxu0 %v5127_v8 }
 0x184   : > { %3494 = vmatmul.mubr.msk.f32.gmra.mrb[120].mxu0 %vm300_vm0, %v2978_v19 }
 0x185   : > { %3095 = vmatprep.mubr.f32.mxu0 %v4672_v0  ;;  %4228 = vmatpush3.bf16.msra.mxu0 %v5135_v11 }
 0x186   : > { %4230 = vmatprep.subr.bf16.mxu0 %v5147_v15 }
 0x187   : > { %v745_v3 = vpop.f32.mrb[16].mxu0 }
 0x188   : > { %v792_v5 = vmul.f32 0.5, %v745_v3  ;;  %v747_v6 = vpop.f32.mrb[17].mxu0  ;;  %3495 = vmatmul.mubr.msk.f32.gmra.mrb[122].mxu0 %vm300_vm0, %v2980_v2 }
 0x189   : > { %v793_v7 = vmul.f32 0.5, %v747_v6  ;;  %3101 = vmatprep.mubr.f32.mxu0 %v4672_v0  ;;  %4232 = vmatpush3.bf16.msra.mxu0 %v5155_v18 }
 0x18a   : > { %4347 = vtanh.f32 %v792_v5  ;;  %4234 = vmatprep.subr.bf16.mxu0 %v5167_v24 }
 0x18b   : > { %4349 = vtanh.f32 %v793_v7  ;;  %v751_v10 = vpop.f32.mrb[18].mxu0 }
 0x18c   : > { %v794_v12 = vmul.f32 0.5, %v751_v10  ;;  %v753_v13 = vpop.f32.mrb[19].mxu0  ;;  %3496 = vmatmul.mubr.msk.f32.gmra.mrb[124].mxu0 %vm300_vm0, %v2982_v9 }
 0x18d   : > { %v795_v14 = vmul.f32 0.5, %v753_v13  ;;  %3107 = vmatprep.mubr.f32.mxu0 %v4672_v0  ;;  %4236 = vmatpush3.bf16.msra.mxu0 %v5175_v27 }
 0x18e   : > { %4351 = vtanh.f32 %v794_v12  ;;  %4238 = vmatprep.subr.bf16.mxu0 %v5187_v31 }
 0x18f   : > { %4353 = vtanh.f32 %v795_v14  ;;  %v757_v17 = vpop.f32.mrb[20].mxu0 }
 0x190   : > { %v796_v20 = vmul.f32 0.5, %v757_v17  ;;  %v759_v21 = vpop.f32.mrb[21].mxu0  ;;  %3497 = vmatmul.mubr.msk.f32.gmra.mrb[126].mxu0 %vm300_vm0, %v2984_v16 }
 0x191   : > { %v797_v22 = vmul.f32 0.5, %v759_v21  ;;  %4240 = vmatpush3.bf16.msra.mxu0 %v5195_v34 }
 0x192   : > { %4355 = vtanh.f32 %v796_v20 }
 0x193   : > { %4357 = vtanh.f32 %v797_v22  ;;  %v763_v25 = vpop.f32.mrb[22].mxu0 }
 0x194   : > { %v4348_v26 = vpop.eup %4347  ;;  %v798_v28 = vmul.f32 0.5, %v763_v25  ;;  %v765_v0 = vpop.f32.mrb[23].mxu0 }
 0x195   : > { %v4350_v29 = vpop.eup %4349  ;;  %v824_v30 = vmul.f32 0.5, %v4348_v26  ;;  %v799_v32 = vmul.f32 0.5, %v765_v0 }
 0x196   : > { %v825_v33 = vmul.f32 0.5, %v4350_v29  ;;  %4359 = vtanh.f32 %v798_v28 }
 0x197   : > { %4361 = vtanh.f32 %v799_v32  ;;  %v769_v35 = vpop.f32.mrb[24].mxu0  ;;  %v840_v41 = vadd.f32 0.5, %v824_v30 }
 0x198   : > { %v4352_v36 = vpop.eup %4351  ;;  %v800_v37 = vmul.f32 0.5, %v769_v35  ;;  %v771_v38 = vpop.f32.mrb[25].mxu0  ;;  %v841_v39 = vadd.f32 0.5, %v825_v33 }
 0x199   : > { %v4354_v40 = vpop.eup %4353  ;;  %v826_v42 = vmul.f32 0.5, %v4352_v36  ;;  %v801_v44 = vmul.f32 0.5, %v771_v38 }
 0x19a   : > { %v827_v45 = vmul.f32 0.5, %v4354_v40  ;;  %4363 = vtanh.f32 %v800_v37  ;;  %920 = vmatprep.mubr.f32.mxu1 %v841_v39 }
 0x19b   : > { %4365 = vtanh.f32 %v801_v44  ;;  %v775_v47 = vpop.f32.mrb[26].mxu0  ;;  %921 = vmatmul.mubr.f32.vlgmr.msra.gmra.mrb[16].mxu1 %v840_v41  ;;  %v842_v56 = vadd.f32 0.5, %v826_v42 }
 0x19c   : > { %v4356_v48 = vpop.eup %4355  ;;  %v802_v49 = vmul.f32 0.5, %v775_v47  ;;  %v777_v51 = vpop.f32.mrb[27].mxu0  ;;  %4032 = vmatpush3.bf16.msra.mxu1 %v5055_v46  ;;  %v843_v52 = vadd.f32 0.5, %v827_v45 }
 0x19d   : > { %v4358_v54 = vpop.eup %4357  ;;  %v828_v55 = vmul.f32 0.5, %v4356_v48  ;;  %v803_v23 = vmul.f32 0.5, %v777_v51  ;;  %4034 = vmatprep.subr.bf16.mxu1 %v5067_v50 }
 0x19e   : > { %v829_v58 = vmul.f32 0.5, %v4358_v54  ;;  %4367 = vtanh.f32 %v802_v49  ;;  %925 = vmatprep.mubr.f32.mxu1 %v843_v52 }
 0x19f   : > { %4369 = vtanh.f32 %v803_v23  ;;  %v781_v59 = vpop.f32.mrb[28].mxu0  ;;  %926 = vmatmul.mubr.f32.gmra.mrb[18].mxu1 %v842_v56  ;;  %v844_v6 = vadd.f32 0.5, %v828_v55 }
 0x1a0   : > { %v4360_v61 = vpop.eup %4359  ;;  %v804_v62 = vmul.f32 0.5, %v781_v59  ;;  %v783_v63 = vpop.f32.mrb[29].mxu0  ;;  %4036 = vmatpush3.bf16.msra.mxu1 %v5075_v53  ;;  %v845_v19 = vadd.f32 0.5, %v829_v58 }
 0x1a1   : > { %v4362_v2 = vpop.eup %4361  ;;  %v830_v3 = vmul.f32 0.5, %v4360_v61  ;;  %v805_v5 = vmul.f32 0.5, %v783_v63  ;;  %4038 = vmatprep.subr.bf16.mxu1 %v5087_v57 }
 0x1a2   : > { %v831_v7 = vmul.f32 0.5, %v4362_v2  ;;  %4371 = vtanh.f32 %v804_v62  ;;  %930 = vmatprep.mubr.f32.mxu1 %v845_v19 }
 0x1a3   : > { %4373 = vtanh.f32 %v805_v5  ;;  %v787_v9 = vpop.f32.mrb[30].mxu0  ;;  %931 = vmatmul.mubr.f32.gmra.mrb[20].mxu1 %v844_v6  ;;  %v846_v21 = vadd.f32 0.5, %v830_v3 }
 0x1a4   : > { %v4364_v10 = vpop.eup %4363  ;;  %v806_v12 = vmul.f32 0.5, %v787_v9  ;;  %v789_v13 = vpop.f32.mrb[31].mxu0  ;;  %4040 = vmatpush3.bf16.msra.mxu1 %v5095_v60  ;;  %v847_v14 = vadd.f32 0.5, %v831_v7 }
 0x1a5   : > { %v4366_v16 = vpop.eup %4365  ;;  %v832_v17 = vmul.f32 0.5, %v4364_v10  ;;  %v807_v20 = vmul.f32 0.5, %v789_v13  ;;  %4042 = vmatprep.subr.bf16.mxu1 %v5107_v1 }
 0x1a6   : > { %v833_v22 = vmul.f32 0.5, %v4366_v16  ;;  %4375 = vtanh.f32 %v806_v12  ;;  %935 = vmatprep.mubr.f32.mxu1 %v847_v14 }
 0x1a7   : > { %4377 = vtanh.f32 %v807_v20  ;;  %936 = vmatmul.mubr.f32.gmra.mrb[22].mxu1 %v846_v21  ;;  %v1132_v25 = vpop.f32.mrb[32].mxu0  ;;  %v848_v35 = vadd.f32 0.5, %v832_v17 }
 0x1a8   : > { %v4368_v26 = vpop.eup %4367  ;;  %v1179_v28 = vmul.f32 0.5, %v1132_v25  ;;  %v1134_v0 = vpop.f32.mrb[33].mxu0  ;;  %4044 = vmatpush3.bf16.msra.mxu1 %v5115_v4  ;;  %v849_v29 = vadd.f32 0.5, %v833_v22 }
 0x1a9   : > { %v4370_v30 = vpop.eup %4369  ;;  %v834_v32 = vmul.f32 0.5, %v4368_v26  ;;  %v1180_v33 = vmul.f32 0.5, %v1134_v0  ;;  %4046 = vmatprep.subr.bf16.mxu1 %v5127_v8 }
 0x1aa   : > { %v835_v36 = vmul.f32 0.5, %v4370_v30  ;;  %4379 = vtanh.f32 %v1179_v28  ;;  %940 = vmatprep.mubr.f32.mxu1 %v849_v29 }
 0x1ab   : > { %4381 = vtanh.f32 %v1180_v33  ;;  %941 = vmatmul.mubr.f32.gmra.mrb[24].mxu1 %v848_v35  ;;  %v1138_v37 = vpop.f32.mrb[34].mxu0  ;;  %v850_v47 = vadd.f32 0.5, %v834_v32 }
 0x1ac   : > { %v4372_v38 = vpop.eup %4371  ;;  %v1181_v39 = vmul.f32 0.5, %v1138_v37  ;;  %v1140_v40 = vpop.f32.mrb[35].mxu0  ;;  %4048 = vmatpush3.bf16.msra.mxu1 %v5135_v11  ;;  %v851_v41 = vadd.f32 0.5, %v835_v36 }
 0x1ad   : > { %v4374_v42 = vpop.eup %4373  ;;  %v836_v44 = vmul.f32 0.5, %v4372_v38  ;;  %v1182_v45 = vmul.f32 0.5, %v1140_v40  ;;  %4050 = vmatprep.subr.bf16.mxu1 %v5147_v15 }
 0x1ae   : > { %v837_v48 = vmul.f32 0.5, %v4374_v42  ;;  %4383 = vtanh.f32 %v1181_v39  ;;  %945 = vmatprep.mubr.f32.mxu1 %v851_v41 }
 0x1af   : > { %4385 = vtanh.f32 %v1182_v45  ;;  %946 = vmatmul.mubr.f32.gmra.mrb[26].mxu1 %v850_v47  ;;  %v1144_v49 = vpop.f32.mrb[36].mxu0  ;;  %v852_v59 = vadd.f32 0.5, %v836_v44 }
 0x1b0   : > { %v4376_v51 = vpop.eup %4375  ;;  %v1183_v52 = vmul.f32 0.5, %v1144_v49  ;;  %v1146_v54 = vpop.f32.mrb[37].mxu0  ;;  %4052 = vmatpush3.bf16.msra.mxu1 %v5155_v18  ;;  %v853_v55 = vadd.f32 0.5, %v837_v48 }
 0x1b1   : > { %v4378_v23 = vpop.eup %4377  ;;  %v838_v56 = vmul.f32 0.5, %v4376_v51  ;;  %v1184_v58 = vmul.f32 0.5, %v1146_v54  ;;  %4054 = vmatprep.subr.bf16.mxu1 %v5167_v24 }
 0x1b2   : > { %v839_v61 = vmul.f32 0.5, %v4378_v23  ;;  %4387 = vtanh.f32 %v1183_v52  ;;  %950 = vmatprep.mubr.f32.mxu1 %v853_v55 }
 0x1b3   : > { %4389 = vtanh.f32 %v1184_v58  ;;  %951 = vmatmul.mubr.f32.gmra.mrb[28].mxu1 %v852_v59  ;;  %v1150_v62 = vpop.f32.mrb[38].mxu0  ;;  %v854_v9 = vadd.f32 0.5, %v838_v56 }
 0x1b4   : > { %v4380_v63 = vpop.eup %4379  ;;  %v1185_v19 = vmul.f32 0.5, %v1150_v62  ;;  %v1152_v2 = vpop.f32.mrb[39].mxu0  ;;  %4056 = vmatpush3.bf16.msra.mxu1 %v5175_v27  ;;  %v855_v3 = vadd.f32 0.5, %v839_v61 }
 0x1b5   : > { %v4382_v5 = vpop.eup %4381  ;;  %v1211_v6 = vmul.f32 0.5, %v4380_v63  ;;  %v1186_v7 = vmul.f32 0.5, %v1152_v2  ;;  %4058 = vmatprep.subr.bf16.mxu1 %v5187_v31 }
 0x1b6   : > { %v1212_v10 = vmul.f32 0.5, %v4382_v5  ;;  %4391 = vtanh.f32 %v1185_v19  ;;  %955 = vmatprep.mubr.f32.mxu1 %v855_v3 }
 0x1b7   : > { %4393 = vtanh.f32 %v1186_v7  ;;  %956 = vmatmul.mubr.f32.gmra.mrb[30].mxu1 %v854_v9  ;;  %v1156_v12 = vpop.f32.mrb[40].mxu0  ;;  %v1227_v21 = vadd.f32 0.5, %v1211_v6 }
 0x1b8   : > { %v4384_v13 = vpop.eup %4383  ;;  %v1187_v14 = vmul.f32 0.5, %v1156_v12  ;;  %v1158_v16 = vpop.f32.mrb[41].mxu0  ;;  %4060 = vmatpush3.bf16.msra.mxu1 %v5195_v34  ;;  %v1228_v17 = vadd.f32 0.5, %v1212_v10 }
 0x1b9   : > { %v4386_v20 = vpop.eup %4385  ;;  %v1213_v22 = vmul.f32 0.5, %v4384_v13  ;;  %v1188_v25 = vmul.f32 0.5, %v1158_v16  ;;  %4066 = vmatprep.subr.bf16.mxu1 %v5047_v43 }
 0x1ba   : > { %v1214_v26 = vmul.f32 0.5, %v4386_v20  ;;  %4395 = vtanh.f32 %v1187_v14  ;;  %1307 = vmatprep.mubr.f32.mxu1 %v1228_v17 }
 0x1bb   : > { %4397 = vtanh.f32 %v1188_v25  ;;  %v1162_v28 = vpop.f32.mrb[42].mxu0  ;;  %1308 = vmatmul.mubr.f32.vlgmr.msra.gmra.mrb[32].mxu1 %v1227_v21  ;;  %v1229_v37 = vadd.f32 0.5, %v1213_v22 }
 0x1bc   : > { %v4388_v0 = vpop.eup %4387  ;;  %v1189_v29 = vmul.f32 0.5, %v1162_v28  ;;  %v1164_v30 = vpop.f32.mrb[43].mxu0  ;;  %4068 = vmatpush3.bf16.msra.mxu1 %v5055_v46  ;;  %v1230_v32 = vadd.f32 0.5, %v1214_v26 }
 0x1bd   : > { %v4390_v33 = vpop.eup %4389  ;;  %v1215_v35 = vmul.f32 0.5, %v4388_v0  ;;  %v1190_v36 = vmul.f32 0.5, %v1164_v30  ;;  %4070 = vmatprep.subr.bf16.mxu1 %v5067_v50 }
 0x1be   : > { %v1216_v38 = vmul.f32 0.5, %v4390_v33  ;;  %4399 = vtanh.f32 %v1189_v29  ;;  %1312 = vmatprep.mubr.f32.mxu1 %v1230_v32 }
 0x1bf   : > { %4401 = vtanh.f32 %v1190_v36  ;;  %v1168_v39 = vpop.f32.mrb[44].mxu0  ;;  %1313 = vmatmul.mubr.f32.gmra.mrb[34].mxu1 %v1229_v37  ;;  %v1231_v49 = vadd.f32 0.5, %v1215_v35 }
 0x1c0   : > { %v4392_v40 = vpop.eup %4391  ;;  %v1191_v41 = vmul.f32 0.5, %v1168_v39  ;;  %v1170_v42 = vpop.f32.mrb[45].mxu0  ;;  %4072 = vmatpush3.bf16.msra.mxu1 %v5075_v53  ;;  %v1232_v44 = vadd.f32 0.5, %v1216_v38 }
 0x1c1   : > { %v4394_v45 = vpop.eup %4393  ;;  %v1217_v47 = vmul.f32 0.5, %v4392_v40  ;;  %v1192_v48 = vmul.f32 0.5, %v1170_v42  ;;  %4074 = vmatprep.subr.bf16.mxu1 %v5087_v57 }
 0x1c2   : > { %v1218_v51 = vmul.f32 0.5, %v4394_v45  ;;  %4403 = vtanh.f32 %v1191_v41  ;;  %1317 = vmatprep.mubr.f32.mxu1 %v1232_v44 }
 0x1c3   : > { %4405 = vtanh.f32 %v1192_v48  ;;  %v1174_v52 = vpop.f32.mrb[46].mxu0  ;;  %1318 = vmatmul.mubr.f32.gmra.mrb[36].mxu1 %v1231_v49  ;;  %v1233_v62 = vadd.f32 0.5, %v1217_v47 }
 0x1c4   : > { %v4396_v54 = vpop.eup %4395  ;;  %v1193_v55 = vmul.f32 0.5, %v1174_v52  ;;  %v1176_v23 = vpop.f32.mrb[47].mxu0  ;;  %4076 = vmatpush3.bf16.msra.mxu1 %v5095_v60  ;;  %v1234_v56 = vadd.f32 0.5, %v1218_v51 }
 0x1c5   : > { %v4398_v58 = vpop.eup %4397  ;;  %v1219_v59 = vmul.f32 0.5, %v4396_v54  ;;  %v1194_v61 = vmul.f32 0.5, %v1176_v23  ;;  %4078 = vmatprep.subr.bf16.mxu1 %v5107_v1 }
 0x1c6   : > { %v1220_v63 = vmul.f32 0.5, %v4398_v58  ;;  %4407 = vtanh.f32 %v1193_v55  ;;  %1322 = vmatprep.mubr.f32.mxu1 %v1234_v56 }
 0x1c7   : > { %4409 = vtanh.f32 %v1194_v61  ;;  %1323 = vmatmul.mubr.f32.gmra.mrb[38].mxu1 %v1233_v62  ;;  %v1519_v19 = vpop.f32.mrb[48].mxu0  ;;  %v1235_v12 = vadd.f32 0.5, %v1219_v59 }
 0x1c8   : > { %v4400_v2 = vpop.eup %4399  ;;  %v1566_v3 = vmul.f32 0.5, %v1519_v19  ;;  %v1521_v5 = vpop.f32.mrb[49].mxu0  ;;  %4080 = vmatpush3.bf16.msra.mxu1 %v5115_v4  ;;  %v1236_v6 = vadd.f32 0.5, %v1220_v63 }
 0x1c9   : > { %v4402_v7 = vpop.eup %4401  ;;  %v1221_v9 = vmul.f32 0.5, %v4400_v2  ;;  %v1567_v10 = vmul.f32 0.5, %v1521_v5  ;;  %4082 = vmatprep.subr.bf16.mxu1 %v5127_v8 }
 0x1ca   : > { %v1222_v13 = vmul.f32 0.5, %v4402_v7  ;;  %4411 = vtanh.f32 %v1566_v3  ;;  %1327 = vmatprep.mubr.f32.mxu1 %v1236_v6 }
 0x1cb   : > { %4413 = vtanh.f32 %v1567_v10  ;;  %1328 = vmatmul.mubr.f32.gmra.mrb[40].mxu1 %v1235_v12  ;;  %v1525_v14 = vpop.f32.mrb[50].mxu0  ;;  %v1237_v28 = vadd.f32 0.5, %v1221_v9 }
 0x1cc   : > { %v4404_v16 = vpop.eup %4403  ;;  %v1568_v17 = vmul.f32 0.5, %v1525_v14  ;;  %v1527_v20 = vpop.f32.mrb[51].mxu0  ;;  %4084 = vmatpush3.bf16.msra.mxu1 %v5135_v11  ;;  %v1238_v21 = vadd.f32 0.5, %v1222_v13 }
 0x1cd   : > { %v4406_v22 = vpop.eup %4405  ;;  %v1223_v25 = vmul.f32 0.5, %v4404_v16  ;;  %v1569_v26 = vmul.f32 0.5, %v1527_v20  ;;  %4086 = vmatprep.subr.bf16.mxu1 %v5147_v15 }
 0x1ce   : > { %v1224_v0 = vmul.f32 0.5, %v4406_v22  ;;  %4415 = vtanh.f32 %v1568_v17  ;;  %1332 = vmatprep.mubr.f32.mxu1 %v1238_v21 }
 0x1cf   : > { %4417 = vtanh.f32 %v1569_v26  ;;  %1333 = vmatmul.mubr.f32.gmra.mrb[42].mxu1 %v1237_v28  ;;  %v1531_v29 = vpop.f32.mrb[52].mxu0  ;;  %v1239_v39 = vadd.f32 0.5, %v1223_v25 }
 0x1d0   : > { %v4408_v30 = vpop.eup %4407  ;;  %v1570_v32 = vmul.f32 0.5, %v1531_v29  ;;  %v1533_v33 = vpop.f32.mrb[53].mxu0  ;;  %4088 = vmatpush3.bf16.msra.mxu1 %v5155_v18  ;;  %v1240_v35 = vadd.f32 0.5, %v1224_v0 }
 0x1d1   : > { %v4410_v36 = vpop.eup %4409  ;;  %v1225_v37 = vmul.f32 0.5, %v4408_v30  ;;  %v1571_v38 = vmul.f32 0.5, %v1533_v33  ;;  %4090 = vmatprep.subr.bf16.mxu1 %v5167_v24 }
 0x1d2   : > { %v1226_v40 = vmul.f32 0.5, %v4410_v36  ;;  %4419 = vtanh.f32 %v1570_v32  ;;  %1337 = vmatprep.mubr.f32.mxu1 %v1240_v35 }
 0x1d3   : > { %4421 = vtanh.f32 %v1571_v38  ;;  %1338 = vmatmul.mubr.f32.gmra.mrb[44].mxu1 %v1239_v39  ;;  %v1537_v41 = vpop.f32.mrb[54].mxu0  ;;  %v1241_v52 = vadd.f32 0.5, %v1225_v37 }
 0x1d4   : > { %v4412_v42 = vpop.eup %4411  ;;  %v1572_v44 = vmul.f32 0.5, %v1537_v41  ;;  %v1539_v45 = vpop.f32.mrb[55].mxu0  ;;  %4092 = vmatpush3.bf16.msra.mxu1 %v5175_v27  ;;  %v1242_v47 = vadd.f32 0.5, %v1226_v40 }
 0x1d5   : > { %v4414_v48 = vpop.eup %4413  ;;  %v1598_v49 = vmul.f32 0.5, %v4412_v42  ;;  %v1573_v51 = vmul.f32 0.5, %v1539_v45  ;;  %4094 = vmatprep.subr.bf16.mxu1 %v5187_v31 }
 0x1d6   : > { %v1599_v54 = vmul.f32 0.5, %v4414_v48  ;;  %4423 = vtanh.f32 %v1572_v44  ;;  %1342 = vmatprep.mubr.f32.mxu1 %v1242_v47 }
 0x1d7   : > { %4425 = vtanh.f32 %v1573_v51  ;;  %1343 = vmatmul.mubr.f32.gmra.mrb[46].mxu1 %v1241_v52  ;;  %v1543_v55 = vpop.f32.mrb[56].mxu0  ;;  %v1614_v62 = vadd.f32 0.5, %v1598_v49 }
 0x1d8   : > { %v4416_v23 = vpop.eup %4415  ;;  %v1574_v56 = vmul.f32 0.5, %v1543_v55  ;;  %v1545_v58 = vpop.f32.mrb[57].mxu0  ;;  %4096 = vmatpush3.bf16.msra.mxu1 %v5195_v34  ;;  %v1615_v59 = vadd.f32 0.5, %v1599_v54 }
 0x1d9   : > { %v4418_v61 = vpop.eup %4417  ;;  %v1600_v63 = vmul.f32 0.5, %v4416_v23  ;;  %v1575_v19 = vmul.f32 0.5, %v1545_v58  ;;  %4102 = vmatprep.subr.bf16.mxu1 %v5047_v43 }
 0x1da   : > { %v1601_v2 = vmul.f32 0.5, %v4418_v61  ;;  %4427 = vtanh.f32 %v1574_v56  ;;  %1694 = vmatprep.mubr.f32.mxu1 %v1615_v59 }
 0x1db   : > { %4429 = vtanh.f32 %v1575_v19  ;;  %v1549_v3 = vpop.f32.mrb[58].mxu0  ;;  %1695 = vmatmul.mubr.f32.vlgmr.msra.gmra.mrb[48].mxu1 %v1614_v62  ;;  %v1616_v14 = vadd.f32 0.5, %v1600_v63 }
 0x1dc   : > { %v4420_v5 = vpop.eup %4419  ;;  %v1576_v6 = vmul.f32 0.5, %v1549_v3  ;;  %v1551_v7 = vpop.f32.mrb[59].mxu0  ;;  %4104 = vmatpush3.bf16.msra.mxu1 %v5055_v46  ;;  %v1617_v9 = vadd.f32 0.5, %v1601_v2 }
 0x1dd   : > { %v4422_v10 = vpop.eup %4421  ;;  %v1602_v12 = vmul.f32 0.5, %v4420_v5  ;;  %v1577_v13 = vmul.f32 0.5, %v1551_v7  ;;  %4106 = vmatprep.subr.bf16.mxu1 %v5067_v50 }
 0x1de   : > { %v1603_v16 = vmul.f32 0.5, %v4422_v10  ;;  %4431 = vtanh.f32 %v1576_v6  ;;  %1699 = vmatprep.mubr.f32.mxu1 %v1617_v9 }
 0x1df   : > { %4433 = vtanh.f32 %v1577_v13  ;;  %v1555_v17 = vpop.f32.mrb[60].mxu0  ;;  %1700 = vmatmul.mubr.f32.gmra.mrb[50].mxu1 %v1616_v14  ;;  %v1618_v29 = vadd.f32 0.5, %v1602_v12 }
 0x1e0   : > { %v4424_v20 = vpop.eup %4423  ;;  %v1578_v21 = vmul.f32 0.5, %v1555_v17  ;;  %v1557_v22 = vpop.f32.mrb[61].mxu0  ;;  %4108 = vmatpush3.bf16.msra.mxu1 %v5075_v53  ;;  %v1619_v25 = vadd.f32 0.5, %v1603_v16 }
 0x1e1   : > { %v4426_v26 = vpop.eup %4425  ;;  %v1604_v28 = vmul.f32 0.5, %v4424_v20  ;;  %v1579_v0 = vmul.f32 0.5, %v1557_v22  ;;  %4110 = vmatprep.subr.bf16.mxu1 %v5087_v57 }
 0x1e2   : > { %v1605_v30 = vmul.f32 0.5, %v4426_v26  ;;  %4435 = vtanh.f32 %v1578_v21  ;;  %1704 = vmatprep.mubr.f32.mxu1 %v1619_v25 }
 0x1e3   : > { %4437 = vtanh.f32 %v1579_v0  ;;  %v1561_v32 = vpop.f32.mrb[62].mxu0  ;;  %1705 = vmatmul.mubr.f32.gmra.mrb[52].mxu1 %v1618_v29  ;;  %v1620_v41 = vadd.f32 0.5, %v1604_v28 }
 0x1e4   : > { %v4428_v33 = vpop.eup %4427  ;;  %v1580_v35 = vmul.f32 0.5, %v1561_v32  ;;  %v1563_v36 = vpop.f32.mrb[63].mxu0  ;;  %4112 = vmatpush3.bf16.msra.mxu1 %v5095_v60  ;;  %v1621_v37 = vadd.f32 0.5, %v1605_v30 }
 0x1e5   : > { %v4430_v38 = vpop.eup %4429  ;;  %v1606_v39 = vmul.f32 0.5, %v4428_v33  ;;  %v1581_v40 = vmul.f32 0.5, %v1563_v36  ;;  %4114 = vmatprep.subr.bf16.mxu1 %v5107_v1 }
 0x1e6   : > { %v1607_v42 = vmul.f32 0.5, %v4430_v38  ;;  %4439 = vtanh.f32 %v1580_v35  ;;  %1709 = vmatprep.mubr.f32.mxu1 %v1621_v37 }
 0x1e7   : > { %4441 = vtanh.f32 %v1581_v40  ;;  %1710 = vmatmul.mubr.f32.gmra.mrb[54].mxu1 %v1620_v41  ;;  %v1906_v44 = vpop.f32.mrb[64].mxu0  ;;  %v1622_v55 = vadd.f32 0.5, %v1606_v39 }
 0x1e8   : > { %v4432_v45 = vpop.eup %4431  ;;  %v1953_v47 = vmul.f32 0.5, %v1906_v44  ;;  %v1908_v48 = vpop.f32.mrb[65].mxu0  ;;  %4116 = vmatpush3.bf16.msra.mxu1 %v5115_v4  ;;  %v1623_v49 = vadd.f32 0.5, %v1607_v42 }
 0x1e9   : > { %v4434_v51 = vpop.eup %4433  ;;  %v1608_v52 = vmul.f32 0.5, %v4432_v45  ;;  %v1954_v54 = vmul.f32 0.5, %v1908_v48  ;;  %4118 = vmatprep.subr.bf16.mxu1 %v5127_v8 }
 0x1ea   : > { %v1609_v23 = vmul.f32 0.5, %v4434_v51  ;;  %4443 = vtanh.f32 %v1953_v47  ;;  %1714 = vmatprep.mubr.f32.mxu1 %v1623_v49 }
 0x1eb   : > { %4445 = vtanh.f32 %v1954_v54  ;;  %1715 = vmatmul.mubr.f32.gmra.mrb[56].mxu1 %v1622_v55  ;;  %v1912_v56 = vpop.f32.mrb[66].mxu0  ;;  %v1624_v3 = vadd.f32 0.5, %v1608_v52 }
 0x1ec   : > { %v4436_v58 = vpop.eup %4435  ;;  %v1955_v59 = vmul.f32 0.5, %v1912_v56  ;;  %v1914_v61 = vpop.f32.mrb[67].mxu0  ;;  %4120 = vmatpush3.bf16.msra.mxu1 %v5135_v11  ;;  %v1625_v62 = vadd.f32 0.5, %v1609_v23 }
 0x1ed   : > { %v4438_v63 = vpop.eup %4437  ;;  %v1610_v19 = vmul.f32 0.5, %v4436_v58  ;;  %v1956_v2 = vmul.f32 0.5, %v1914_v61  ;;  %4122 = vmatprep.subr.bf16.mxu1 %v5147_v15 }
 0x1ee   : > { %v1611_v5 = vmul.f32 0.5, %v4438_v63  ;;  %4447 = vtanh.f32 %v1955_v59  ;;  %1719 = vmatprep.mubr.f32.mxu1 %v1625_v62 }
 0x1ef   : > { %4449 = vtanh.f32 %v1956_v2  ;;  %1720 = vmatmul.mubr.f32.gmra.mrb[58].mxu1 %v1624_v3  ;;  %v1918_v6 = vpop.f32.mrb[68].mxu0  ;;  %v1626_v17 = vadd.f32 0.5, %v1610_v19 }
 0x1f0   : > { %v4440_v7 = vpop.eup %4439  ;;  %v1957_v9 = vmul.f32 0.5, %v1918_v6  ;;  %v1920_v10 = vpop.f32.mrb[69].mxu0  ;;  %4124 = vmatpush3.bf16.msra.mxu1 %v5155_v18  ;;  %v1627_v12 = vadd.f32 0.5, %v1611_v5 }
 0x1f1   : > { %v4442_v13 = vpop.eup %4441  ;;  %v1612_v14 = vmul.f32 0.5, %v4440_v7  ;;  %v1958_v16 = vmul.f32 0.5, %v1920_v10  ;;  %4126 = vmatprep.subr.bf16.mxu1 %v5167_v24 }
 0x1f2   : > { %v1613_v20 = vmul.f32 0.5, %v4442_v13  ;;  %4451 = vtanh.f32 %v1957_v9  ;;  %1724 = vmatprep.mubr.f32.mxu1 %v1627_v12 }
 0x1f3   : > { %4453 = vtanh.f32 %v1958_v16  ;;  %1725 = vmatmul.mubr.f32.gmra.mrb[60].mxu1 %v1626_v17  ;;  %v1924_v21 = vpop.f32.mrb[70].mxu0  ;;  %v1628_v32 = vadd.f32 0.5, %v1612_v14 }
 0x1f4   : > { %v4444_v22 = vpop.eup %4443  ;;  %v1959_v25 = vmul.f32 0.5, %v1924_v21  ;;  %v1926_v26 = vpop.f32.mrb[71].mxu0  ;;  %4128 = vmatpush3.bf16.msra.mxu1 %v5175_v27  ;;  %v1629_v28 = vadd.f32 0.5, %v1613_v20 }
 0x1f5   : > { %v4446_v0 = vpop.eup %4445  ;;  %v1985_v29 = vmul.f32 0.5, %v4444_v22  ;;  %v1960_v30 = vmul.f32 0.5, %v1926_v26  ;;  %4130 = vmatprep.subr.bf16.mxu1 %v5187_v31 }
 0x1f6   : > { %v1986_v33 = vmul.f32 0.5, %v4446_v0  ;;  %4455 = vtanh.f32 %v1959_v25  ;;  %1729 = vmatprep.mubr.f32.mxu1 %v1629_v28 }
 0x1f7   : > { %4457 = vtanh.f32 %v1960_v30  ;;  %1730 = vmatmul.mubr.f32.gmra.mrb[62].mxu1 %v1628_v32  ;;  %v1930_v35 = vpop.f32.mrb[72].mxu0  ;;  %v2001_v41 = vadd.f32 0.5, %v1985_v29 }
 0x1f8   : > { %v4448_v36 = vpop.eup %4447  ;;  %v1961_v37 = vmul.f32 0.5, %v1930_v35  ;;  %v1932_v38 = vpop.f32.mrb[73].mxu0  ;;  %4132 = vmatpush3.bf16.msra.mxu1 %v5195_v34  ;;  %v2002_v39 = vadd.f32 0.5, %v1986_v33 }
 0x1f9   : > { %v4450_v40 = vpop.eup %4449  ;;  %v1987_v42 = vmul.f32 0.5, %v4448_v36  ;;  %v1962_v44 = vmul.f32 0.5, %v1932_v38  ;;  %4138 = vmatprep.subr.bf16.mxu1 %v5047_v43 }
 0x1fa   : > { %v1988_v45 = vmul.f32 0.5, %v4450_v40  ;;  %4459 = vtanh.f32 %v1961_v37  ;;  %2081 = vmatprep.mubr.f32.mxu1 %v2002_v39 }
 0x1fb   : > { %4461 = vtanh.f32 %v1962_v44  ;;  %v1936_v47 = vpop.f32.mrb[74].mxu0  ;;  %2082 = vmatmul.mubr.f32.vlgmr.msra.gmra.mrb[64].mxu1 %v2001_v41  ;;  %v2003_v56 = vadd.f32 0.5, %v1987_v42 }
 0x1fc   : > { %v4452_v48 = vpop.eup %4451  ;;  %v1963_v49 = vmul.f32 0.5, %v1936_v47  ;;  %v1938_v51 = vpop.f32.mrb[75].mxu0  ;;  %4140 = vmatpush3.bf16.msra.mxu1 %v5055_v46  ;;  %v2004_v52 = vadd.f32 0.5, %v1988_v45 }
 0x1fd   : > { %v4454_v54 = vpop.eup %4453  ;;  %v1989_v55 = vmul.f32 0.5, %v4452_v48  ;;  %v1964_v23 = vmul.f32 0.5, %v1938_v51  ;;  %4142 = vmatprep.subr.bf16.mxu1 %v5067_v50  ;;  %v3537_v16 = vpop.f32.mrb[0].mxu1 }
 0x1fe   : > { %v1990_v58 = vmul.f32 0.5, %v4454_v54  ;;  %4463 = vtanh.f32 %v1963_v49  ;;  %2086 = vmatprep.mubr.f32.mxu1 %v2004_v52  ;;  %v3538_v25 = vpop.f32.mrb[1].mxu1 }
 0x1ff   : > { %4465 = vtanh.f32 %v1964_v23  ;;  %v1942_v59 = vpop.f32.mrb[76].mxu0  ;;  %2087 = vmatmul.mubr.f32.gmra.mrb[66].mxu1 %v2003_v56  ;;  %v2005_v6 = vadd.f32 0.5, %v1989_v55  ;;  %v3539_v28 = vadd.f32 %v3538_v25, %v3537_v16 }
 0x200   : > { %v4456_v61 = vpop.eup %4455  ;;  %v1965_v62 = vmul.f32 0.5, %v1942_v59  ;;  %v1944_v63 = vpop.f32.mrb[77].mxu0  ;;  %4144 = vmatpush3.bf16.msra.mxu1 %v5075_v53  ;;  %v2006_v19 = vadd.f32 0.5, %v1990_v58 }
 0x201   : > { %v4458_v2 = vpop.eup %4457  ;;  %v1991_v3 = vmul.f32 0.5, %v4456_v61  ;;  %v1966_v5 = vmul.f32 0.5, %v1944_v63  ;;  %4146 = vmatprep.subr.bf16.mxu1 %v5087_v57  ;;  %607 = vst.msk [vmem:[%s5375_s25] sm:$0xff] %vm300_vm0, %v3539_v28  ;;  %v3540_v39 = vpop.f32.mrb[2].mxu1 }
 0x202   : > { %v1992_v7 = vmul.f32 0.5, %v4458_v2  ;;  %4467 = vtanh.f32 %v1965_v62  ;;  %2091 = vmatprep.mubr.f32.mxu1 %v2006_v19  ;;  %v3541_v41 = vpop.f32.mrb[3].mxu1 }
 0x203   : > { %4469 = vtanh.f32 %v1966_v5  ;;  %v1948_v9 = vpop.f32.mrb[78].mxu0  ;;  %2092 = vmatmul.mubr.f32.gmra.mrb[68].mxu1 %v2005_v6  ;;  %v2007_v22 = vadd.f32 0.5, %v1991_v3  ;;  %v3542_v44 = vadd.f32 %v3541_v41, %v3540_v39 }
 0x204   : > { %v4460_v10 = vpop.eup %4459  ;;  %v1967_v12 = vmul.f32 0.5, %v1948_v9  ;;  %v1950_v13 = vpop.f32.mrb[79].mxu0  ;;  %4148 = vmatpush3.bf16.msra.mxu1 %v5095_v60  ;;  %v2008_v14 = vadd.f32 0.5, %v1992_v7 }
 0x205   : > { %v4462_v17 = vpop.eup %4461  ;;  %v1993_v20 = vmul.f32 0.5, %v4460_v10  ;;  %v1968_v21 = vmul.f32 0.5, %v1950_v13  ;;  %4150 = vmatprep.subr.bf16.mxu1 %v5107_v1  ;;  %608 = vst.msk [vmem:[%s5375_s25 + $0x8] sm:$0xff] %vm300_vm0, %v3542_v44  ;;  %v3543_v23 = vpop.f32.mrb[4].mxu1 }
 0x206   : > { %v1994_v26 = vmul.f32 0.5, %v4462_v17  ;;  %4471 = vtanh.f32 %v1967_v12  ;;  %2096 = vmatprep.mubr.f32.mxu1 %v2008_v14  ;;  %v3544_v58 = vpop.f32.mrb[5].mxu1 }
 0x207   : > { %4473 = vtanh.f32 %v1968_v21  ;;  %2097 = vmatmul.mubr.f32.gmra.mrb[70].mxu1 %v2007_v22  ;;  %v2293_v0 = vpop.f32.mrb[80].mxu0  ;;  %v2009_v38 = vadd.f32 0.5, %v1993_v20  ;;  %v3545_v61 = vadd.f32 %v3544_v58, %v3543_v23 }
 0x208   : > { %v4464_v29 = vpop.eup %4463  ;;  %v2340_v30 = vmul.f32 0.5, %v2293_v0  ;;  %v2295_v32 = vpop.f32.mrb[81].mxu0  ;;  %4152 = vmatpush3.bf16.msra.mxu1 %v5115_v4  ;;  %v2010_v33 = vadd.f32 0.5, %v1994_v26 }
 0x209   : > { %v4466_v35 = vpop.eup %4465  ;;  %v1995_v36 = vmul.f32 0.5, %v4464_v29  ;;  %v2341_v37 = vmul.f32 0.5, %v2295_v32  ;;  %4154 = vmatprep.subr.bf16.mxu1 %v5127_v8  ;;  %609 = vst.msk [vmem:[%s5375_s25 + $0x10] sm:$0xff] %vm300_vm0, %v3545_v61  ;;  %v3546_v9 = vpop.f32.mrb[6].mxu1 }
 0x20a   : > { %v1996_v40 = vmul.f32 0.5, %v4466_v35  ;;  %4475 = vtanh.f32 %v2340_v30  ;;  %2101 = vmatprep.mubr.f32.mxu1 %v2010_v33  ;;  %v3547_v12 = vpop.f32.mrb[7].mxu1 }
 0x20b   : > { %4477 = vtanh.f32 %v2341_v37  ;;  %2102 = vmatmul.mubr.f32.gmra.mrb[72].mxu1 %v2009_v38  ;;  %v2299_v42 = vpop.f32.mrb[82].mxu0  ;;  %v2011_v55 = vadd.f32 0.5, %v1995_v36  ;;  %v3548_v14 = vadd.f32 %v3547_v12, %v3546_v9 }
 0x20c   : > { %v4468_v45 = vpop.eup %4467  ;;  %v2342_v47 = vmul.f32 0.5, %v2299_v42  ;;  %v2301_v48 = vpop.f32.mrb[83].mxu0  ;;  %4156 = vmatpush3.bf16.msra.mxu1 %v5135_v11  ;;  %v2012_v49 = vadd.f32 0.5, %v1996_v40 }
 0x20d   : > { %v4470_v51 = vpop.eup %4469  ;;  %v1997_v52 = vmul.f32 0.5, %v4468_v45  ;;  %v2343_v54 = vmul.f32 0.5, %v2301_v48  ;;  %4158 = vmatprep.subr.bf16.mxu1 %v5147_v15  ;;  %610 = vst.msk [vmem:[%s5375_s25 + $0x18] sm:$0xff] %vm300_vm0, %v3548_v14  ;;  %v3549_v0 = vpop.f32.mrb[8].mxu1 }
 0x20e   : > { %v1998_v56 = vmul.f32 0.5, %v4470_v51  ;;  %4479 = vtanh.f32 %v2342_v47  ;;  %2106 = vmatprep.mubr.f32.mxu1 %v2012_v49  ;;  %v3550_v30 = vpop.f32.mrb[9].mxu1 }
 0x20f   : > { %4481 = vtanh.f32 %v2343_v54  ;;  %2107 = vmatmul.mubr.f32.gmra.mrb[74].mxu1 %v2011_v55  ;;  %v2305_v59 = vpop.f32.mrb[84].mxu0  ;;  %v2013_v7 = vadd.f32 0.5, %v1997_v52  ;;  %v3551_v33 = vadd.f32 %v3550_v30, %v3549_v0 }
 0x210   : > { %v4472_v62 = vpop.eup %4471  ;;  %v2344_v63 = vmul.f32 0.5, %v2305_v59  ;;  %v2307_v19 = vpop.f32.mrb[85].mxu0  ;;  %4160 = vmatpush3.bf16.msra.mxu1 %v5155_v18  ;;  %v2014_v2 = vadd.f32 0.5, %v1998_v56 }
 0x211   : > { %v4474_v3 = vpop.eup %4473  ;;  %v1999_v5 = vmul.f32 0.5, %v4472_v62  ;;  %v2345_v6 = vmul.f32 0.5, %v2307_v19  ;;  %4162 = vmatprep.subr.bf16.mxu1 %v5167_v24  ;;  %611 = vst.msk [vmem:[%s5375_s25 + $0x20] sm:$0xff] %vm300_vm0, %v3551_v33  ;;  %v3552_v44 = vpop.f32.mrb[10].mxu1 }
 0x212   : > { %v2000_v10 = vmul.f32 0.5, %v4474_v3  ;;  %4483 = vtanh.f32 %v2344_v63  ;;  %2111 = vmatprep.mubr.f32.mxu1 %v2014_v2  ;;  %v3553_v47 = vpop.f32.mrb[11].mxu1 }
 0x213   : > { %4485 = vtanh.f32 %v2345_v6  ;;  %2112 = vmatmul.mubr.f32.gmra.mrb[76].mxu1 %v2013_v7  ;;  %v2311_v13 = vpop.f32.mrb[86].mxu0  ;;  %v2015_v28 = vadd.f32 0.5, %v1999_v5  ;;  %v3554_v49 = vadd.f32 %v3553_v47, %v3552_v44 }
 0x214   : > { %v4476_v16 = vpop.eup %4475  ;;  %v2346_v17 = vmul.f32 0.5, %v2311_v13  ;;  %v2313_v20 = vpop.f32.mrb[87].mxu0  ;;  %4164 = vmatpush3.bf16.msra.mxu1 %v5175_v27  ;;  %v2016_v21 = vadd.f32 0.5, %v2000_v10 }
 0x215   : > { %v4478_v22 = vpop.eup %4477  ;;  %v2372_v25 = vmul.f32 0.5, %v4476_v16  ;;  %v2347_v26 = vmul.f32 0.5, %v2313_v20  ;;  %4166 = vmatprep.subr.bf16.mxu1 %v5187_v31  ;;  %612 = vst.msk [vmem:[%s5375_s25 + $0x28] sm:$0xff] %vm300_vm0, %v3554_v49  ;;  %v3555_v61 = vpop.f32.mrb[12].mxu1 }
 0x216   : > { %v2373_v29 = vmul.f32 0.5, %v4478_v22  ;;  %4487 = vtanh.f32 %v2346_v17  ;;  %2116 = vmatprep.mubr.f32.mxu1 %v2016_v21  ;;  %v3556_v63 = vpop.f32.mrb[13].mxu1 }
 0x217   : > { %4489 = vtanh.f32 %v2347_v26  ;;  %2117 = vmatmul.mubr.f32.gmra.mrb[78].mxu1 %v2015_v28  ;;  %v2317_v32 = vpop.f32.mrb[88].mxu0  ;;  %v2388_v40 = vadd.f32 0.5, %v2372_v25  ;;  %v3557_v2 = vadd.f32 %v3556_v63, %v3555_v61 }
 0x218   : > { %v4480_v35 = vpop.eup %4479  ;;  %v2348_v36 = vmul.f32 0.5, %v2317_v32  ;;  %v2319_v37 = vpop.f32.mrb[89].mxu0  ;;  %4168 = vmatpush3.bf16.msra.mxu1 %v5195_v34  ;;  %v2389_v38 = vadd.f32 0.5, %v2373_v29 }
 0x219   : > { %v4482_v39 = vpop.eup %4481  ;;  %v2374_v41 = vmul.f32 0.5, %v4480_v35  ;;  %v2349_v42 = vmul.f32 0.5, %v2319_v37  ;;  %4174 = vmatprep.subr.bf16.mxu1 %v5047_v43  ;;  %613 = vst.msk [vmem:[%s5375_s25 + $0x30] sm:$0xff] %vm300_vm0, %v3557_v2 }
 0x21a   : > { %v2375_v45 = vmul.f32 0.5, %v4482_v39  ;;  %4491 = vtanh.f32 %v2348_v36  ;;  %2468 = vmatprep.mubr.f32.mxu1 %v2389_v38 }
 0x21b   : > { %4493 = vtanh.f32 %v2349_v42  ;;  %v2323_v48 = vpop.f32.mrb[90].mxu0  ;;  %2469 = vmatmul.mubr.f32.vlgmr.msra.gmra.mrb[80].mxu1 %v2388_v40  ;;  %v2390_v59 = vadd.f32 0.5, %v2374_v41 }
 0x21c   : > { %v4484_v51 = vpop.eup %4483  ;;  %v2350_v52 = vmul.f32 0.5, %v2323_v48  ;;  %v2325_v54 = vpop.f32.mrb[91].mxu0  ;;  %4176 = vmatpush3.bf16.msra.mxu1 %v5055_v46  ;;  %v2391_v55 = vadd.f32 0.5, %v2375_v45 }
 0x21d   : > { %v4486_v23 = vpop.eup %4485  ;;  %v2376_v56 = vmul.f32 0.5, %v4484_v51  ;;  %v2351_v58 = vmul.f32 0.5, %v2325_v54  ;;  %4178 = vmatprep.subr.bf16.mxu1 %v5067_v50  ;;  %v3558_v14 = vpop.f32.mrb[14].mxu1 }
 0x21e   : > { %v2377_v62 = vmul.f32 0.5, %v4486_v23  ;;  %4495 = vtanh.f32 %v2350_v52  ;;  %2473 = vmatprep.mubr.f32.mxu1 %v2391_v55  ;;  %v3559_v17 = vpop.f32.mrb[15].mxu1 }
 0x21f   : > { %4497 = vtanh.f32 %v2351_v58  ;;  %v2329_v19 = vpop.f32.mrb[92].mxu0  ;;  %2474 = vmatmul.mubr.f32.gmra.mrb[82].mxu1 %v2390_v59  ;;  %v2392_v13 = vadd.f32 0.5, %v2376_v56  ;;  %v3560_v21 = vadd.f32 %v3559_v17, %v3558_v14 }
 0x220   : > { %v4488_v3 = vpop.eup %4487  ;;  %v2352_v5 = vmul.f32 0.5, %v2329_v19  ;;  %v2331_v6 = vpop.f32.mrb[93].mxu0  ;;  %4180 = vmatpush3.bf16.msra.mxu1 %v5075_v53  ;;  %v2393_v7 = vadd.f32 0.5, %v2377_v62 }
 0x221   : > { %v4490_v9 = vpop.eup %4489  ;;  %v2378_v10 = vmul.f32 0.5, %v4488_v3  ;;  %v2353_v12 = vmul.f32 0.5, %v2331_v6  ;;  %4182 = vmatprep.subr.bf16.mxu1 %v5087_v57  ;;  %614 = vst.msk [vmem:[%s5375_s25 + $0x38] sm:$0xff] %vm300_vm0, %v3560_v21 }
 0x222   : > { %v2379_v16 = vmul.f32 0.5, %v4490_v9  ;;  %4499 = vtanh.f32 %v2352_v5  ;;  %2478 = vmatprep.mubr.f32.mxu1 %v2393_v7 }
 0x223   : > { %4501 = vtanh.f32 %v2353_v12  ;;  %v2335_v20 = vpop.f32.mrb[94].mxu0  ;;  %2479 = vmatmul.mubr.f32.gmra.mrb[84].mxu1 %v2392_v13  ;;  %v2394_v32 = vadd.f32 0.5, %v2378_v10 }
 0x224   : > { %v4492_v22 = vpop.eup %4491  ;;  %v2354_v25 = vmul.f32 0.5, %v2335_v20  ;;  %v2337_v26 = vpop.f32.mrb[95].mxu0  ;;  %4184 = vmatpush3.bf16.msra.mxu1 %v5095_v60  ;;  %v2395_v28 = vadd.f32 0.5, %v2379_v16 }
 0x225   : > { %v4494_v0 = vpop.eup %4493  ;;  %v2380_v29 = vmul.f32 0.5, %v4492_v22  ;;  %v2355_v30 = vmul.f32 0.5, %v2337_v26  ;;  %4186 = vmatprep.subr.bf16.mxu1 %v5107_v1 }
 0x226   : > { %v2381_v33 = vmul.f32 0.5, %v4494_v0  ;;  %4503 = vtanh.f32 %v2354_v25  ;;  %2483 = vmatprep.mubr.f32.mxu1 %v2395_v28 }
 0x227   : > { %4505 = vtanh.f32 %v2355_v30  ;;  %2484 = vmatmul.mubr.f32.gmra.mrb[86].mxu1 %v2394_v32  ;;  %v2680_v35 = vpop.f32.mrb[96].mxu0  ;;  %v2396_v44 = vadd.f32 0.5, %v2380_v29 }
 0x228   : > { %v4496_v36 = vpop.eup %4495  ;;  %v2727_v37 = vmul.f32 0.5, %v2680_v35  ;;  %v2682_v38 = vpop.f32.mrb[97].mxu0  ;;  %4188 = vmatpush3.bf16.msra.mxu1 %v5115_v4  ;;  %v2397_v39 = vadd.f32 0.5, %v2381_v33 }
 0x229   : > { %v4498_v40 = vpop.eup %4497  ;;  %v2382_v41 = vmul.f32 0.5, %v4496_v36  ;;  %v2728_v42 = vmul.f32 0.5, %v2682_v38  ;;  %4190 = vmatprep.subr.bf16.mxu1 %v5127_v8 }
 0x22a   : > { %v2383_v45 = vmul.f32 0.5, %v4498_v40  ;;  %4507 = vtanh.f32 %v2727_v37  ;;  %2488 = vmatprep.mubr.f32.mxu1 %v2397_v39 }
 0x22b   : > { %4509 = vtanh.f32 %v2728_v42  ;;  %2489 = vmatmul.mubr.f32.gmra.mrb[88].mxu1 %v2396_v44  ;;  %v2686_v47 = vpop.f32.mrb[98].mxu0  ;;  %v2398_v56 = vadd.f32 0.5, %v2382_v41 }
 0x22c   : > { %v4500_v48 = vpop.eup %4499  ;;  %v2729_v49 = vmul.f32 0.5, %v2686_v47  ;;  %v2688_v51 = vpop.f32.mrb[99].mxu0  ;;  %4192 = vmatpush3.bf16.msra.mxu1 %v5135_v11  ;;  %v2399_v52 = vadd.f32 0.5, %v2383_v45 }
 0x22d   : > { %v4502_v54 = vpop.eup %4501  ;;  %v2384_v55 = vmul.f32 0.5, %v4500_v48  ;;  %v2730_v23 = vmul.f32 0.5, %v2688_v51  ;;  %4194 = vmatprep.subr.bf16.mxu1 %v5147_v15 }
 0x22e   : > { %v2385_v58 = vmul.f32 0.5, %v4502_v54  ;;  %4511 = vtanh.f32 %v2729_v49  ;;  %2493 = vmatprep.mubr.f32.mxu1 %v2399_v52 }
 0x22f   : > { %4513 = vtanh.f32 %v2730_v23  ;;  %2494 = vmatmul.mubr.f32.gmra.mrb[90].mxu1 %v2398_v56  ;;  %v2692_v59 = vpop.f32.mrb[100].mxu0  ;;  %v2400_v6 = vadd.f32 0.5, %v2384_v55 }
 0x230   : > { %v4504_v61 = vpop.eup %4503  ;;  %v2731_v62 = vmul.f32 0.5, %v2692_v59  ;;  %v2694_v63 = vpop.f32.mrb[101].mxu0  ;;  %4196 = vmatpush3.bf16.msra.mxu1 %v5155_v18  ;;  %v2401_v19 = vadd.f32 0.5, %v2385_v58 }
 0x231   : > { %v4506_v2 = vpop.eup %4505  ;;  %v2386_v3 = vmul.f32 0.5, %v4504_v61  ;;  %v2732_v5 = vmul.f32 0.5, %v2694_v63  ;;  %4198 = vmatprep.subr.bf16.mxu1 %v5167_v24 }
 0x232   : > { %v2387_v7 = vmul.f32 0.5, %v4506_v2  ;;  %4515 = vtanh.f32 %v2731_v62  ;;  %2498 = vmatprep.mubr.f32.mxu1 %v2401_v19 }
 0x233   : > { %4517 = vtanh.f32 %v2732_v5  ;;  %2499 = vmatmul.mubr.f32.gmra.mrb[92].mxu1 %v2400_v6  ;;  %v2698_v9 = vpop.f32.mrb[102].mxu0  ;;  %v2402_v21 = vadd.f32 0.5, %v2386_v3 }
 0x234   : > { %v4508_v10 = vpop.eup %4507  ;;  %v2733_v12 = vmul.f32 0.5, %v2698_v9  ;;  %v2700_v13 = vpop.f32.mrb[103].mxu0  ;;  %4200 = vmatpush3.bf16.msra.mxu1 %v5175_v27  ;;  %v2403_v14 = vadd.f32 0.5, %v2387_v7 }
 0x235   : > { %v4510_v16 = vpop.eup %4509  ;;  %v2759_v17 = vmul.f32 0.5, %v4508_v10  ;;  %v2734_v20 = vmul.f32 0.5, %v2700_v13  ;;  %4202 = vmatprep.subr.bf16.mxu1 %v5187_v31 }
 0x236   : > { %v2760_v22 = vmul.f32 0.5, %v4510_v16  ;;  %4519 = vtanh.f32 %v2733_v12  ;;  %2503 = vmatprep.mubr.f32.mxu1 %v2403_v14 }
 0x237   : > { %4521 = vtanh.f32 %v2734_v20  ;;  %2504 = vmatmul.mubr.f32.gmra.mrb[94].mxu1 %v2402_v21  ;;  %v2704_v25 = vpop.f32.mrb[104].mxu0  ;;  %v2775_v32 = vadd.f32 0.5, %v2759_v17 }
 0x238   : > { %v4512_v26 = vpop.eup %4511  ;;  %v2735_v28 = vmul.f32 0.5, %v2704_v25  ;;  %v2706_v0 = vpop.f32.mrb[105].mxu0  ;;  %4204 = vmatpush3.bf16.msra.mxu1 %v5195_v34  ;;  %v2776_v29 = vadd.f32 0.5, %v2760_v22 }
 0x239   : > { %v4514_v30 = vpop.eup %4513  ;;  %v2761_v33 = vmul.f32 0.5, %v4512_v26  ;;  %v2736_v35 = vmul.f32 0.5, %v2706_v0  ;;  %4241 = vmatprep.subr.bf16.mxu1 %v5047_v43 }
 0x23a   : > { %v2762_v36 = vmul.f32 0.5, %v4514_v30  ;;  %4523 = vtanh.f32 %v2735_v28  ;;  %2855 = vmatprep.mubr.f32.mxu1 %v2776_v29 }
 0x23b   : > { %4525 = vtanh.f32 %v2736_v35  ;;  %v2710_v37 = vpop.f32.mrb[106].mxu0  ;;  %2856 = vmatmul.mubr.f32.vlgmr.msra.gmra.mrb[96].mxu1 %v2775_v32  ;;  %v2777_v47 = vadd.f32 0.5, %v2761_v33 }
 0x23c   : > { %v4516_v38 = vpop.eup %4515  ;;  %v2737_v39 = vmul.f32 0.5, %v2710_v37  ;;  %v2712_v40 = vpop.f32.mrb[107].mxu0  ;;  %v2778_v41 = vadd.f32 0.5, %v2762_v36  ;;  %4249 = vmatpush3.bf16.msra.mxu1 %v5055_v46 }
 0x23d   : > { %v4518_v42 = vpop.eup %4517  ;;  %v2763_v44 = vmul.f32 0.5, %v4516_v38  ;;  %v2738_v45 = vmul.f32 0.5, %v2712_v40  ;;  %4242 = vmatprep.subr.bf16.mxu1 %v5067_v50 }
 0x23e   : > { %v2764_v48 = vmul.f32 0.5, %v4518_v42  ;;  %4527 = vtanh.f32 %v2737_v39  ;;  %2860 = vmatprep.mubr.f32.mxu1 %v2778_v41 }
 0x23f   : > { %4529 = vtanh.f32 %v2738_v45  ;;  %v2716_v43 = vpop.f32.mrb[108].mxu0  ;;  %2861 = vmatmul.mubr.f32.gmra.mrb[98].mxu1 %v2777_v47  ;;  %v2779_v56 = vadd.f32 0.5, %v2763_v44 }
 0x240   : > { %v4520_v49 = vpop.eup %4519  ;;  %v2739_v51 = vmul.f32 0.5, %v2716_v43  ;;  %v2718_v52 = vpop.f32.mrb[109].mxu0  ;;  %v2780_v54 = vadd.f32 0.5, %v2764_v48  ;;  %4250 = vmatpush3.bf16.msra.mxu1 %v5075_v53 }
 0x241   : > { %v4522_v55 = vpop.eup %4521  ;;  %v2765_v46 = vmul.f32 0.5, %v4520_v49  ;;  %v2740_v23 = vmul.f32 0.5, %v2718_v52  ;;  %4243 = vmatprep.subr.bf16.mxu1 %v5087_v57 }
 0x242   : > { %v2766_v58 = vmul.f32 0.5, %v4522_v55  ;;  %4531 = vtanh.f32 %v2739_v51  ;;  %2865 = vmatprep.mubr.f32.mxu1 %v2780_v54 }
 0x243   : > { %4533 = vtanh.f32 %v2740_v23  ;;  %v2722_v50 = vpop.f32.mrb[110].mxu0  ;;  %2866 = vmatmul.mubr.f32.gmra.mrb[100].mxu1 %v2779_v56  ;;  %v2781_v3 = vadd.f32 0.5, %v2765_v46 }
 0x244   : > { %v4524_v59 = vpop.eup %4523  ;;  %v2741_v61 = vmul.f32 0.5, %v2722_v50  ;;  %v2724_v62 = vpop.f32.mrb[111].mxu0  ;;  %v2782_v63 = vadd.f32 0.5, %v2766_v58  ;;  %4251 = vmatpush3.bf16.msra.mxu1 %v5095_v60 }
 0x245   : > { %v4526_v19 = vpop.eup %4525  ;;  %v2767_v53 = vmul.f32 0.5, %v4524_v59  ;;  %v2742_v2 = vmul.f32 0.5, %v2724_v62  ;;  %4244 = vmatprep.subr.bf16.mxu1 %v5107_v1 }
 0x246   : > { %v2768_v5 = vmul.f32 0.5, %v4526_v19  ;;  %4535 = vtanh.f32 %v2741_v61  ;;  %2870 = vmatprep.mubr.f32.mxu1 %v2782_v63 }
 0x247   : > { %4537 = vtanh.f32 %v2742_v2  ;;  %2871 = vmatmul.mubr.f32.gmra.mrb[102].mxu1 %v2781_v3  ;;  %v3067_v57 = vpop.f32.mrb[112].mxu0  ;;  %v2783_v14 = vadd.f32 0.5, %v2767_v53 }
 0x248   : > { %v4528_v6 = vpop.eup %4527  ;;  %v3114_v7 = vmul.f32 0.5, %v3067_v57  ;;  %v3069_v9 = vpop.f32.mrb[113].mxu0  ;;  %v2784_v10 = vadd.f32 0.5, %v2768_v5  ;;  %4252 = vmatpush3.bf16.msra.mxu1 %v5115_v4 }
 0x249   : > { %v4530_v12 = vpop.eup %4529  ;;  %v2769_v60 = vmul.f32 0.5, %v4528_v6  ;;  %v3115_v13 = vmul.f32 0.5, %v3069_v9  ;;  %4245 = vmatprep.subr.bf16.mxu1 %v5127_v8 }
 0x24a   : > { %v2770_v16 = vmul.f32 0.5, %v4530_v12  ;;  %4539 = vtanh.f32 %v3114_v7  ;;  %2875 = vmatprep.mubr.f32.mxu1 %v2784_v10 }
 0x24b   : > { %4541 = vtanh.f32 %v3115_v13  ;;  %2876 = vmatmul.mubr.f32.gmra.mrb[104].mxu1 %v2783_v14  ;;  %v3073_v1 = vpop.f32.mrb[114].mxu0  ;;  %v2785_v28 = vadd.f32 0.5, %v2769_v60 }
 0x24c   : > { %v4532_v17 = vpop.eup %4531  ;;  %v3116_v20 = vmul.f32 0.5, %v3073_v1  ;;  %v3075_v21 = vpop.f32.mrb[115].mxu0  ;;  %v2786_v22 = vadd.f32 0.5, %v2770_v16  ;;  %4253 = vmatpush3.bf16.msra.mxu1 %v5135_v11 }
 0x24d   : > { %v4534_v25 = vpop.eup %4533  ;;  %v2771_v4 = vmul.f32 0.5, %v4532_v17  ;;  %v3117_v26 = vmul.f32 0.5, %v3075_v21  ;;  %4246 = vmatprep.subr.bf16.mxu1 %v5147_v15 }
 0x24e   : > { %v2772_v0 = vmul.f32 0.5, %v4534_v25  ;;  %4543 = vtanh.f32 %v3116_v20  ;;  %2880 = vmatprep.mubr.f32.mxu1 %v2786_v22 }
 0x24f   : > { %4545 = vtanh.f32 %v3117_v26  ;;  %2881 = vmatmul.mubr.f32.gmra.mrb[106].mxu1 %v2785_v28  ;;  %v3079_v8 = vpop.f32.mrb[116].mxu0  ;;  %v2787_v37 = vadd.f32 0.5, %v2771_v4 }
 0x250   : > { %v4536_v29 = vpop.eup %4535  ;;  %v3118_v30 = vmul.f32 0.5, %v3079_v8  ;;  %v3081_v32 = vpop.f32.mrb[117].mxu0  ;;  %v2788_v33 = vadd.f32 0.5, %v2772_v0  ;;  %4254 = vmatpush3.bf16.msra.mxu1 %v5155_v18 }
 0x251   : > { %v4538_v35 = vpop.eup %4537  ;;  %v2773_v11 = vmul.f32 0.5, %v4536_v29  ;;  %v3119_v36 = vmul.f32 0.5, %v3081_v32  ;;  %4247 = vmatprep.subr.bf16.mxu1 %v5167_v24 }
 0x252   : > { %v2774_v38 = vmul.f32 0.5, %v4538_v35  ;;  %4547 = vtanh.f32 %v3118_v30  ;;  %2885 = vmatprep.mubr.f32.mxu1 %v2788_v33 }
 0x253   : > { %4549 = vtanh.f32 %v3119_v36  ;;  %2886 = vmatmul.mubr.f32.gmra.mrb[108].mxu1 %v2787_v37  ;;  %v3085_v15 = vpop.f32.mrb[118].mxu0  ;;  %v2789_v47 = vadd.f32 0.5, %v2773_v11 }
 0x254   : > { %v4540_v39 = vpop.eup %4539  ;;  %v3120_v40 = vmul.f32 0.5, %v3085_v15  ;;  %v3087_v41 = vpop.f32.mrb[119].mxu0  ;;  %v2790_v42 = vadd.f32 0.5, %v2774_v38  ;;  %4255 = vmatpush3.bf16.msra.mxu1 %v5175_v27 }
 0x255   : > { %v4542_v44 = vpop.eup %4541  ;;  %v3146_v18 = vmul.f32 0.5, %v4540_v39  ;;  %v3121_v45 = vmul.f32 0.5, %v3087_v41  ;;  %4248 = vmatprep.subr.bf16.mxu1 %v5187_v31 }
 0x256   : > { %v3147_v48 = vmul.f32 0.5, %v4542_v44  ;;  %4551 = vtanh.f32 %v3120_v40  ;;  %2890 = vmatprep.mubr.f32.mxu1 %v2790_v42 }
 0x257   : > { %4553 = vtanh.f32 %v3121_v45  ;;  %2891 = vmatmul.mubr.f32.gmra.mrb[110].mxu1 %v2789_v47  ;;  %v3091_v24 = vpop.f32.mrb[120].mxu0  ;;  %v3162_v27 = vadd.f32 0.5, %v3146_v18 }
 0x258   : > { %v4544_v43 = vpop.eup %4543  ;;  %v3122_v49 = vmul.f32 0.5, %v3091_v24  ;;  %v3093_v51 = vpop.f32.mrb[121].mxu0  ;;  %v3163_v52 = vadd.f32 0.5, %v3147_v48  ;;  %4256 = vmatpush3.bf16.msra.mxu1 %v5195_v34 }
 0x259   : > { %v4546_v54 = vpop.eup %4545  ;;  %v3148_v55 = vmul.f32 0.5, %v4544_v43  ;;  %v3123_v46 = vmul.f32 0.5, %v3093_v51 }
 0x25a   : > { %v3149_v23 = vmul.f32 0.5, %v4546_v54  ;;  %4555 = vtanh.f32 %v3122_v49  ;;  %3242 = vmatprep.mubr.f32.mxu0 %v3163_v52 }
 0x25b   : > { %4557 = vtanh.f32 %v3123_v46  ;;  %v3097_v31 = vpop.f32.mrb[122].mxu0  ;;  %3243 = vmatmul.mubr.f32.vlgmr.msra.gmra.mrb[128].mxu0 %v3162_v27  ;;  %v3164_v19 = vadd.f32 0.5, %v3148_v55 }
 0x25c   : > { %v4548_v56 = vpop.eup %4547  ;;  %v3124_v58 = vmul.f32 0.5, %v3097_v31  ;;  %v3099_v50 = vpop.f32.mrb[123].mxu0  ;;  %v3165_v59 = vadd.f32 0.5, %v3149_v23 }
 0x25d   : > { %v4550_v61 = vpop.eup %4549  ;;  %v3150_v62 = vmul.f32 0.5, %v4548_v56  ;;  %v3125_v63 = vmul.f32 0.5, %v3099_v50 }
 0x25e   : > { %v3151_v53 = vmul.f32 0.5, %v4550_v61  ;;  %4559 = vtanh.f32 %v3124_v58  ;;  %3247 = vmatprep.mubr.f32.mxu0 %v3165_v59 }
 0x25f   : > { %4561 = vtanh.f32 %v3125_v63  ;;  %v3103_v34 = vpop.f32.mrb[124].mxu0  ;;  %3248 = vmatmul.mubr.f32.gmra.mrb[130].mxu0 %v3164_v19  ;;  %v3166_v10 = vadd.f32 0.5, %v3150_v62 }
 0x260   : > { %v4552_v2 = vpop.eup %4551  ;;  %v3126_v3 = vmul.f32 0.5, %v3103_v34  ;;  %v3105_v5 = vpop.f32.mrb[125].mxu0  ;;  %v3167_v57 = vadd.f32 0.5, %v3151_v53 }
 0x261   : > { %v4554_v6 = vpop.eup %4553  ;;  %v3152_v7 = vmul.f32 0.5, %v4552_v2  ;;  %v3127_v9 = vmul.f32 0.5, %v3105_v5 }
 0x262   : > { %v3153_v12 = vmul.f32 0.5, %v4554_v6  ;;  %4563 = vtanh.f32 %v3126_v3  ;;  %3252 = vmatprep.mubr.f32.mxu0 %v3167_v57 }
 0x263   : > { %4565 = vtanh.f32 %v3127_v9  ;;  %v3109_v60 = vpop.f32.mrb[126].mxu0  ;;  %3253 = vmatmul.mubr.f32.gmra.mrb[132].mxu0 %v3166_v10  ;;  %v3168_v20 = vadd.f32 0.5, %v3152_v7 }
 0x264   : > { %v4556_v13 = vpop.eup %4555  ;;  %v3128_v14 = vmul.f32 0.5, %v3109_v60  ;;  %v3111_v16 = vpop.f32.mrb[127].mxu0  ;;  %v3169_v1 = vadd.f32 0.5, %v3153_v12 }
 0x265   : > { %v4558_v17 = vpop.eup %4557  ;;  %v3154_v21 = vmul.f32 0.5, %v4556_v13  ;;  %v3129_v22 = vmul.f32 0.5, %v3111_v16 }
 0x266   : > { %v3155_v25 = vmul.f32 0.5, %v4558_v17  ;;  %4567 = vtanh.f32 %v3128_v14  ;;  %3257 = vmatprep.mubr.f32.mxu1 %v3169_v1 }
 0x267   : > { %4569 = vtanh.f32 %v3129_v22  ;;  %3258 = vmatmul.mubr.f32.vlgmr.msra.gmra.mrb[112].mxu1 %v3168_v20  ;;  %v3170_v8 = vadd.f32 0.5, %v3154_v21 }
 0x268   : > { %v4560_v4 = vpop.eup %4559  ;;  %v3171_v26 = vadd.f32 0.5, %v3155_v25 }
 0x269   : > { %v4562_v28 = vpop.eup %4561  ;;  %v3156_v0 = vmul.f32 0.5, %v4560_v4 }
 0x26a   : > { %v3157_v29 = vmul.f32 0.5, %v4562_v28  ;;  %3262 = vmatprep.mubr.f32.mxu1 %v3171_v26 }
 0x26b   : > { %3263 = vmatmul.mubr.f32.gmra.mrb[114].mxu1 %v3170_v8  ;;  %v3172_v11 = vadd.f32 0.5, %v3156_v0 }
 0x26c   : > { %v4564_v30 = vpop.eup %4563  ;;  %v3173_v32 = vadd.f32 0.5, %v3157_v29 }
 0x26d   : > { %v4566_v33 = vpop.eup %4565  ;;  %v3158_v35 = vmul.f32 0.5, %v4564_v30 }
 0x26e   : > { %v3159_v36 = vmul.f32 0.5, %v4566_v33  ;;  %v3593_v37 = vpop.f32.mrb[16].mxu1  ;;  %3267 = vmatprep.mubr.f32.mxu1 %v3173_v32 }
 0x26f   : > { %v3594_v38 = vpop.f32.mrb[17].mxu1  ;;  %3268 = vmatmul.mubr.f32.gmra.mrb[116].mxu1 %v3172_v11  ;;  %v3174_v44 = vadd.f32 0.5, %v3158_v35 }
 0x270   : > { %v4568_v15 = vpop.eup %4567  ;;  %v3595_v39 = vadd.f32 %v3594_v38, %v3593_v37  ;;  %v3175_v40 = vadd.f32 0.5, %v3159_v36 }
 0x271   : > { %v4570_v41 = vpop.eup %4569  ;;  %v3160_v42 = vmul.f32 0.5, %v4568_v15 }
 0x272   : > { %v3161_v18 = vmul.f32 0.5, %v4570_v41  ;;  %v3596_v45 = vpop.f32.mrb[18].mxu1  ;;  %3272 = vmatprep.mubr.f32.mxu1 %v3175_v40  ;;  %969 = vrot.lane.b32.xlu0 %v3595_v39, %s4679_s23 }
 0x273   : > { %v3597_v47 = vpop.f32.mrb[19].mxu1  ;;  %3273 = vmatmul.mubr.f32.gmra.mrb[118].mxu1 %v3174_v44  ;;  %v3176_v43 = vadd.f32 0.5, %v3160_v42 }
 0x274   : > { %v3598_v48 = vadd.f32 %v3597_v47, %v3596_v45  ;;  %v3177_v24 = vadd.f32 0.5, %v3161_v18 }
 0x276   : > { %v3599_v49 = vpop.f32.mrb[20].mxu1  ;;  %3277 = vmatprep.mubr.f32.mxu1 %v3177_v24  ;;  %971 = vrot.lane.b32.xlu1 %v3598_v48, %s4679_s23 }
 0x277   : > { %v3600_v51 = vpop.f32.mrb[21].mxu1  ;;  %3278 = vmatmul.mubr.f32.gmra.mrb[120].mxu1 %v3176_v43 }
 0x278   : > { %v3601_v52 = vadd.f32 %v3600_v51, %v3599_v49 }
 0x27a   : > { %v3602_v54 = vpop.f32.mrb[22].mxu1  ;;  %973 = vrot.lane.b32.xlu0 %v3601_v52, %s4679_s23 }
 0x27b   : > { %v3603_v27 = vpop.f32.mrb[23].mxu1 }
 0x27c   : > { %v3604_v55 = vadd.f32 %v3603_v27, %v3602_v54 }
 0x27e   : > { %v3605_v46 = vpop.f32.mrb[24].mxu1  ;;  %975 = vrot.lane.b32.xlu1 %v3604_v55, %s4679_s23 }
 0x27f   : > { %v3606_v23 = vpop.f32.mrb[25].mxu1 }
 0x280   : > { %v3607_v31 = vadd.f32 %v3606_v23, %v3605_v46 }
 0x282   : > { %v3608_v56 = vpop.f32.mrb[26].mxu1  ;;  %977 = vrot.lane.b32.xlu0 %v3607_v31, %s4679_s23 }
 0x283   : > { %v3609_v58 = vpop.f32.mrb[27].mxu1 }
 0x284   : > { %v3610_v50 = vadd.f32 %v3609_v58, %v3608_v56 }
 0x286   : > { %v3611_v59 = vpop.f32.mrb[28].mxu1  ;;  %979 = vrot.lane.b32.xlu1 %v3610_v50, %s4679_s23 }
 0x287   : > { %v3612_v61 = vpop.f32.mrb[29].mxu1 }
 0x288   : > { %v3613_v62 = vadd.f32 %v3612_v61, %v3611_v59 }
 0x28a   : > { %v3614_v63 = vpop.f32.mrb[30].mxu1  ;;  %981 = vrot.lane.b32.xlu0 %v3613_v62, %s4679_s23 }
 0x28b   : > { %v3615_v19 = vpop.f32.mrb[31].mxu1 }
 0x28c   : > { %v3616_v53 = vadd.f32 %v3615_v19, %v3614_v63 }
 0x28e   : > { %v3649_v34 = vpop.f32.mrb[32].mxu1  ;;  %983 = vrot.lane.b32.xlu1 %v3616_v53, %s4679_s23  ;;  %s4605_s23 = sshll.u32 %s4680_s19, 4  ;;  %s4606_s23 = int_to_ptr.vmem [resolvable:$false] %s4605_s23 }
 0x28f   : > { %v3650_v2 = vpop.f32.mrb[33].mxu1  ;;  %s4607_s29 = scalar_lea.vmem %s4606_s23, 2048 }
 0x290   : > { %v3651_v3 = vadd.f32 %v3650_v2, %v3649_v34 }
 0x292   : > { %v3652_v5 = vpop.f32.mrb[34].mxu1  ;;  %1356 = vrot.lane.b32.xlu0 %v3651_v3, %s4678_s12 }
 0x293   : > { %v3653_v57 = vpop.f32.mrb[35].mxu1 }
 0x294   : > { %v3654_v6 = vadd.f32 %v3653_v57, %v3652_v5 }
 0x296   : > { %v3655_v7 = vpop.f32.mrb[36].mxu1  ;;  %1358 = vrot.lane.b32.xlu1 %v3654_v6, %s4678_s12 }
 0x297   : > { %v3656_v9 = vpop.f32.mrb[37].mxu1 }
 0x298   : > { %v3657_v10 = vadd.f32 %v3656_v9, %v3655_v7 }
 0x29a   : > { %v3658_v12 = vpop.f32.mrb[38].mxu1  ;;  %1360 = vrot.lane.b32.xlu0 %v3657_v10, %s4678_s12 }
 0x29b   : > { %v3659_v60 = vpop.f32.mrb[39].mxu1 }
 0x29c   : > { %v3660_v13 = vadd.f32 %v3659_v60, %v3658_v12 }
 0x29e   : > { %v3661_v14 = vpop.f32.mrb[40].mxu1  ;;  %1362 = vrot.lane.b32.xlu1 %v3660_v13, %s4678_s12 }
 0x29f   : > { %v3662_v16 = vpop.f32.mrb[41].mxu1 }
 0x2a0   : > { %v3663_v1 = vadd.f32 %v3662_v16, %v3661_v14 }
 0x2a2   : > { %v3664_v17 = vpop.f32.mrb[42].mxu1  ;;  %1364 = vrot.lane.b32.xlu0 %v3663_v1, %s4678_s12 }
 0x2a3   : > { %v3665_v20 = vpop.f32.mrb[43].mxu1 }
 0x2a4   : > { %v3666_v21 = vadd.f32 %v3665_v20, %v3664_v17 }
 0x2a6   : > { %v3667_v22 = vpop.f32.mrb[44].mxu1  ;;  %1366 = vrot.lane.b32.xlu1 %v3666_v21, %s4678_s12 }
 0x2a7   : > { %v3668_v25 = vpop.f32.mrb[45].mxu1 }
 0x2a8   : > { %v3669_v4 = vadd.f32 %v3668_v25, %v3667_v22 }
 0x2aa   : > { %v3670_v26 = vpop.f32.mrb[46].mxu1  ;;  %1368 = vrot.lane.b32.xlu0 %v3669_v4, %s4678_s12 }
 0x2ab   : > { %v3671_v28 = vpop.f32.mrb[47].mxu1 }
 0x2ac   : > { %v3672_v0 = vadd.f32 %v3671_v28, %v3670_v26 }
 0x2ae   : > { %v3705_v8 = vpop.f32.mrb[48].mxu1  ;;  %1370 = vrot.lane.b32.xlu1 %v3672_v0, %s4678_s12 }
 0x2af   : > { %v3706_v29 = vpop.f32.mrb[49].mxu1 }
 0x2b0   : > { %v3707_v30 = vadd.f32 %v3706_v29, %v3705_v8 }
 0x2b2   : > { %v3708_v32 = vpop.f32.mrb[50].mxu1  ;;  %1743 = vrot.lane.b32.xlu0 %v3707_v30, %s4677_s11 }
 0x2b3   : > { %v3709_v33 = vpop.f32.mrb[51].mxu1 }
 0x2b4   : > { %v3710_v35 = vadd.f32 %v3709_v33, %v3708_v32 }
 0x2b6   : > { %v3711_v11 = vpop.f32.mrb[52].mxu1  ;;  %1745 = vrot.lane.b32.xlu1 %v3710_v35, %s4677_s11 }
 0x2b7   : > { %v3712_v36 = vpop.f32.mrb[53].mxu1 }
 0x2b8   : > { %v3713_v37 = vadd.f32 %v3712_v36, %v3711_v11 }
 0x2ba   : > { %v3714_v38 = vpop.f32.mrb[54].mxu1  ;;  %1747 = vrot.lane.b32.xlu0 %v3713_v37, %s4677_s11 }
 0x2bb   : > { %v3715_v15 = vpop.f32.mrb[55].mxu1 }
 0x2bc   : > { %v3716_v39 = vadd.f32 %v3715_v15, %v3714_v38 }
 0x2be   : > { %v3717_v40 = vpop.f32.mrb[56].mxu1  ;;  %1749 = vrot.lane.b32.xlu1 %v3716_v39, %s4677_s11 }
 0x2bf   : > { %v3718_v41 = vpop.f32.mrb[57].mxu1 }
 0x2c0   : > { %v3719_v42 = vadd.f32 %v3718_v41, %v3717_v40 }
 0x2c2   : > { %v3720_v44 = vpop.f32.mrb[58].mxu1  ;;  %1751 = vrot.lane.b32.xlu0 %v3719_v42, %s4677_s11 }
 0x2c3   : > { %v3721_v18 = vpop.f32.mrb[59].mxu1 }
 0x2c4   : > { %v3722_v45 = vadd.f32 %v3721_v18, %v3720_v44 }
 0x2c6   : > { %v3723_v47 = vpop.f32.mrb[60].mxu1  ;;  %1753 = vrot.lane.b32.xlu1 %v3722_v45, %s4677_s11 }
 0x2c7   : > { %v3724_v48 = vpop.f32.mrb[61].mxu1 }
 0x2c8   : > { %v3725_v24 = vadd.f32 %v3724_v48, %v3723_v47 }
 0x2ca   : > { %v3726_v43 = vpop.f32.mrb[62].mxu1  ;;  %1755 = vrot.lane.b32.xlu0 %v3725_v24, %s4677_s11 }
 0x2cb   : > { %v3727_v49 = vpop.f32.mrb[63].mxu1 }
 0x2cc   : > { %v3728_v51 = vadd.f32 %v3727_v49, %v3726_v43 }
 0x2ce   : > { %v3761_v52 = vpop.f32.mrb[64].mxu1  ;;  %1757 = vrot.lane.b32.xlu1 %v3728_v51, %s4677_s11  ;;  %s3325_s11 = scalar_lea.sflag [#allocation4], %s4811_s13 }
 0x2cf   : > { %v3762_v54 = vpop.f32.mrb[65].mxu1 }
 0x2d0   : > { %v3763_v27 = vadd.f32 %v3762_v54, %v3761_v52 }
 0x2d2   : > { %v3764_v55 = vpop.f32.mrb[66].mxu1  ;;  %2130 = vrot.lane.b32.xlu0 %v3763_v27, %s4676_s10 }
 0x2d3   : > { %v3765_v46 = vpop.f32.mrb[67].mxu1 }
 0x2d4   : > { %v3766_v23 = vadd.f32 %v3765_v46, %v3764_v55 }
 0x2d6   : > { %v3767_v31 = vpop.f32.mrb[68].mxu1  ;;  %2132 = vrot.lane.b32.xlu1 %v3766_v23, %s4676_s10 }
 0x2d7   : > { %v3768_v56 = vpop.f32.mrb[69].mxu1 }
 0x2d8   : > { %v3769_v58 = vadd.f32 %v3768_v56, %v3767_v31 }
 0x2da   : > { %v3770_v50 = vpop.f32.mrb[70].mxu1  ;;  %2134 = vrot.lane.b32.xlu0 %v3769_v58, %s4676_s10 }
 0x2db   : > { %v3771_v59 = vpop.f32.mrb[71].mxu1 }
 0x2dc   : > { %v3772_v61 = vadd.f32 %v3771_v59, %v3770_v50 }
 0x2de   : > { %v3773_v62 = vpop.f32.mrb[72].mxu1  ;;  %2136 = vrot.lane.b32.xlu1 %v3772_v61, %s4676_s10 }
 0x2df   : > { %v3774_v63 = vpop.f32.mrb[73].mxu1 }
 0x2e0   : > { %v3775_v19 = vadd.f32 %v3774_v63, %v3773_v62 }
 0x2e2   : > { %v3776_v53 = vpop.f32.mrb[74].mxu1  ;;  %2138 = vrot.lane.b32.xlu0 %v3775_v19, %s4676_s10 }
 0x2e3   : > { %v3777_v34 = vpop.f32.mrb[75].mxu1 }
 0x2e4   : > { %v3778_v2 = vadd.f32 %v3777_v34, %v3776_v53  ;;  %v970_v3 = vpop.permute.xlu0 %969 }
 0x2e5   : > { %994 = vst.msk [vmem:[%s5375_s25] sm:$0xff] %vm993_vm1, %v970_v3 }
 0x2e6   : > { %v3779_v5 = vpop.f32.mrb[76].mxu1  ;;  %2140 = vrot.lane.b32.xlu1 %v3778_v2, %s4676_s10 }
 0x2e7   : > { %v3780_v57 = vpop.f32.mrb[77].mxu1 }
 0x2e8   : > { %v3781_v6 = vadd.f32 %v3780_v57, %v3779_v5  ;;  %v972_v7 = vpop.permute.xlu1 %971 }
 0x2e9   : > { %995 = vst.msk [vmem:[%s5375_s25 + $0x8] sm:$0xff] %vm993_vm1, %v972_v7 }
 0x2ea   : > { %v3782_v9 = vpop.f32.mrb[78].mxu1  ;;  %2142 = vrot.lane.b32.xlu0 %v3781_v6, %s4676_s10 }
 0x2eb   : > { %v3783_v10 = vpop.f32.mrb[79].mxu1 }
 0x2ec   : > { %v3784_v12 = vadd.f32 %v3783_v10, %v3782_v9  ;;  %v974_v60 = vpop.permute.xlu0 %973 }
 0x2ed   : > { %996 = vst.msk [vmem:[%s5375_s25 + $0x10] sm:$0xff] %vm993_vm1, %v974_v60 }
 0x2ee   : > { %v3817_v13 = vpop.f32.mrb[80].mxu1  ;;  %2144 = vrot.lane.b32.xlu1 %v3784_v12, %s4676_s10  ;;  %s5604_s10 = scalar_lea.hbm %s5655_s4, %s3504_s14 }
 0x2ef   : > { %v3818_v14 = vpop.f32.mrb[81].mxu1 }
 0x2f0   : > { %v3819_v16 = vadd.f32 %v3818_v14, %v3817_v13  ;;  %v976_v1 = vpop.permute.xlu1 %975 }
 0x2f1   : > { %997 = vst.msk [vmem:[%s5375_s25 + $0x18] sm:$0xff] %vm993_vm1, %v976_v1 }
 0x2f2   : > { %v3820_v17 = vpop.f32.mrb[82].mxu1  ;;  %2517 = vrot.lane.b32.xlu0 %v3819_v16, %s4675_s8 }
 0x2f3   : > { %v3821_v20 = vpop.f32.mrb[83].mxu1 }
 0x2f4   : > { %v3822_v21 = vadd.f32 %v3821_v20, %v3820_v17  ;;  %v978_v22 = vpop.permute.xlu0 %977 }
 0x2f5   : > { %998 = vst.msk [vmem:[%s5375_s25 + $0x20] sm:$0xff] %vm993_vm1, %v978_v22 }
 0x2f6   : > { %v3823_v25 = vpop.f32.mrb[84].mxu1  ;;  %2519 = vrot.lane.b32.xlu1 %v3822_v21, %s4675_s8 }
 0x2f7   : > { %v3824_v4 = vpop.f32.mrb[85].mxu1 }
 0x2f8   : > { %v3825_v26 = vadd.f32 %v3824_v4, %v3823_v25  ;;  %v980_v28 = vpop.permute.xlu1 %979 }
 0x2f9   : > { %999 = vst.msk [vmem:[%s5375_s25 + $0x28] sm:$0xff] %vm993_vm1, %v980_v28 }
 0x2fa   : > { %v3826_v0 = vpop.f32.mrb[86].mxu1  ;;  %2521 = vrot.lane.b32.xlu0 %v3825_v26, %s4675_s8 }
 0x2fb   : > { %v3827_v8 = vpop.f32.mrb[87].mxu1 }
 0x2fc   : > { %v3828_v29 = vadd.f32 %v3827_v8, %v3826_v0  ;;  %v982_v30 = vpop.permute.xlu0 %981 }
 0x2fd   : > { %1000 = vst.msk [vmem:[%s5375_s25 + $0x30] sm:$0xff] %vm993_vm1, %v982_v30 }
 0x2fe   : > { %v3829_v32 = vpop.f32.mrb[88].mxu1  ;;  %2523 = vrot.lane.b32.xlu1 %v3828_v29, %s4675_s8 }
 0x2ff   : > { %v3830_v33 = vpop.f32.mrb[89].mxu1 }
 0x300   : > { %v3831_v35 = vadd.f32 %v3830_v33, %v3829_v32  ;;  %v984_v11 = vpop.permute.xlu1 %983 }
 0x301   : > { %1001 = vst.msk [vmem:[%s5375_s25 + $0x38] sm:$0xff] %vm993_vm1, %v984_v11 }
 0x302   : > { %v3832_v36 = vpop.f32.mrb[90].mxu1  ;;  %2525 = vrot.lane.b32.xlu0 %v3831_v35, %s4675_s8 }
 0x303   : > { %v3833_v37 = vpop.f32.mrb[91].mxu1 }
 0x304   : > { %v3834_v38 = vadd.f32 %v3833_v37, %v3832_v36  ;;  %v1357_v15 = vpop.permute.xlu0 %1356 }
 0x305   : > { %1381 = vst.msk [vmem:[%s5375_s25] sm:$0xff] %vm1380_vm2, %v1357_v15 }
 0x306   : > { %v3835_v39 = vpop.f32.mrb[92].mxu1  ;;  %2527 = vrot.lane.b32.xlu1 %v3834_v38, %s4675_s8 }
 0x307   : > { %v3836_v40 = vpop.f32.mrb[93].mxu1 }
 0x308   : > { %v3837_v41 = vadd.f32 %v3836_v40, %v3835_v39  ;;  %v1359_v42 = vpop.permute.xlu1 %1358 }
 0x309   : > { %1382 = vst.msk [vmem:[%s5375_s25 + $0x8] sm:$0xff] %vm1380_vm2, %v1359_v42 }
 0x30a   : > { %v3838_v44 = vpop.f32.mrb[94].mxu1  ;;  %2529 = vrot.lane.b32.xlu0 %v3837_v41, %s4675_s8 }
 0x30b   : > { %v3839_v18 = vpop.f32.mrb[95].mxu1 }
 0x30c   : > { %v3840_v45 = vadd.f32 %v3839_v18, %v3838_v44  ;;  %v1361_v47 = vpop.permute.xlu0 %1360 }
 0x30d   : > { %1383 = vst.msk [vmem:[%s5375_s25 + $0x10] sm:$0xff] %vm1380_vm2, %v1361_v47 }
 0x30e   : > { %v3873_v48 = vpop.f32.mrb[96].mxu1  ;;  %2531 = vrot.lane.b32.xlu1 %v3840_v45, %s4675_s8 }
 0x30f   : > { %v3874_v24 = vpop.f32.mrb[97].mxu1 }
 0x310   : > { %v3875_v43 = vadd.f32 %v3874_v24, %v3873_v48  ;;  %v1363_v49 = vpop.permute.xlu1 %1362 }
 0x311   : > { %1384 = vst.msk [vmem:[%s5375_s25 + $0x18] sm:$0xff] %vm1380_vm2, %v1363_v49 }
 0x312   : > { %v3876_v51 = vpop.f32.mrb[98].mxu1  ;;  %2904 = vrot.lane.b32.xlu0 %v3875_v43, %s4674_s22 }
 0x313   : > { %v3877_v52 = vpop.f32.mrb[99].mxu1 }
 0x314   : > { %v3878_v54 = vadd.f32 %v3877_v52, %v3876_v51  ;;  %v1365_v27 = vpop.permute.xlu0 %1364 }
 0x315   : > { %1385 = vst.msk [vmem:[%s5375_s25 + $0x20] sm:$0xff] %vm1380_vm2, %v1365_v27 }
 0x316   : > { %v3879_v55 = vpop.f32.mrb[100].mxu1  ;;  %2906 = vrot.lane.b32.xlu1 %v3878_v54, %s4674_s22 }
 0x317   : > { %v3880_v46 = vpop.f32.mrb[101].mxu1 }
 0x318   : > { %v3881_v23 = vadd.f32 %v3880_v46, %v3879_v55  ;;  %v1367_v31 = vpop.permute.xlu1 %1366 }
 0x319   : > { %1386 = vst.msk [vmem:[%s5375_s25 + $0x28] sm:$0xff] %vm1380_vm2, %v1367_v31 }
 0x31a   : > { %v3882_v56 = vpop.f32.mrb[102].mxu1  ;;  %2908 = vrot.lane.b32.xlu0 %v3881_v23, %s4674_s22 }
 0x31b   : > { %v3883_v58 = vpop.f32.mrb[103].mxu1 }
 0x31c   : > { %v3884_v50 = vadd.f32 %v3883_v58, %v3882_v56  ;;  %v1369_v59 = vpop.permute.xlu0 %1368 }
 0x31d   : > { %1387 = vst.msk [vmem:[%s5375_s25 + $0x30] sm:$0xff] %vm1380_vm2, %v1369_v59 }
 0x31e   : > { %v3885_v61 = vpop.f32.mrb[104].mxu1  ;;  %2910 = vrot.lane.b32.xlu1 %v3884_v50, %s4674_s22 }
 0x31f   : > { %v3886_v62 = vpop.f32.mrb[105].mxu1 }
 0x320   : > { %v3887_v63 = vadd.f32 %v3886_v62, %v3885_v61  ;;  %v1371_v19 = vpop.permute.xlu1 %1370 }
 0x321   : > { %1388 = vst.msk [vmem:[%s5375_s25 + $0x38] sm:$0xff] %vm1380_vm2, %v1371_v19 }
 0x322   : > { %v3888_v53 = vpop.f32.mrb[106].mxu1  ;;  %2912 = vrot.lane.b32.xlu0 %v3887_v63, %s4674_s22 }
 0x323   : > { %v3889_v34 = vpop.f32.mrb[107].mxu1 }
 0x324   : > { %v3890_v2 = vadd.f32 %v3889_v34, %v3888_v53  ;;  %v1744_v3 = vpop.permute.xlu0 %1743 }
 0x325   : > { %1768 = vst.msk [vmem:[%s5375_s25] sm:$0xff] %vm1767_vm3, %v1744_v3 }
 0x326   : > { %v3891_v5 = vpop.f32.mrb[108].mxu1  ;;  %2914 = vrot.lane.b32.xlu1 %v3890_v2, %s4674_s22 }
 0x327   : > { %v3892_v57 = vpop.f32.mrb[109].mxu1 }
 0x328   : > { %v3893_v6 = vadd.f32 %v3892_v57, %v3891_v5  ;;  %v1746_v7 = vpop.permute.xlu1 %1745 }
 0x329   : > { %1769 = vst.msk [vmem:[%s5375_s25 + $0x8] sm:$0xff] %vm1767_vm3, %v1746_v7 }
 0x32a   : > { %v3894_v9 = vpop.f32.mrb[110].mxu1  ;;  %2916 = vrot.lane.b32.xlu0 %v3893_v6, %s4674_s22 }
 0x32b   : > { %v3895_v10 = vpop.f32.mrb[111].mxu1 }
 0x32c   : > { %v3896_v12 = vadd.f32 %v3895_v10, %v3894_v9  ;;  %v1748_v60 = vpop.permute.xlu0 %1747 }
 0x32d   : > { %1770 = vst.msk [vmem:[%s5375_s25 + $0x10] sm:$0xff] %vm1767_vm3, %v1748_v60 }
 0x32e   : > { %v3929_v13 = vpop.f32.mrb[128].mxu0  ;;  %2918 = vrot.lane.b32.xlu1 %v3896_v12, %s4674_s22 }
 0x32f   : > { %v3930_v14 = vpop.f32.mrb[129].mxu0 }
 0x330   : > { %v3931_v16 = vadd.f32 %v3930_v14, %v3929_v13  ;;  %v1750_v1 = vpop.permute.xlu1 %1749 }
 0x331   : > { %1771 = vst.msk [vmem:[%s5375_s25 + $0x18] sm:$0xff] %vm1767_vm3, %v1750_v1 }
 0x332   : > { %v3932_v17 = vpop.f32.mrb[130].mxu0  ;;  %3291 = vrot.lane.b32.xlu0 %v3931_v16, %s4673_s26 }
 0x333   : > { %v3933_v20 = vpop.f32.mrb[131].mxu0 }
 0x334   : > { %v3934_v21 = vadd.f32 %v3933_v20, %v3932_v17  ;;  %v1752_v22 = vpop.permute.xlu0 %1751 }
 0x335   : > { %1772 = vst.msk [vmem:[%s5375_s25 + $0x20] sm:$0xff] %vm1767_vm3, %v1752_v22 }
 0x336   : > { %v3935_v25 = vpop.f32.mrb[132].mxu0  ;;  %3293 = vrot.lane.b32.xlu1 %v3934_v21, %s4673_s26 }
 0x337   : > { %v3936_v4 = vpop.f32.mrb[133].mxu0 }
 0x338   : > { %v3937_v26 = vadd.f32 %v3936_v4, %v3935_v25  ;;  %v1754_v28 = vpop.permute.xlu1 %1753 }
 0x339   : > { %1773 = vst.msk [vmem:[%s5375_s25 + $0x28] sm:$0xff] %vm1767_vm3, %v1754_v28 }
 0x33a   : > { %v3938_v0 = vpop.f32.mrb[112].mxu1  ;;  %3295 = vrot.lane.b32.xlu0 %v3937_v26, %s4673_s26 }
 0x33b   : > { %v3939_v8 = vpop.f32.mrb[113].mxu1 }
 0x33c   : > { %v3940_v29 = vadd.f32 %v3939_v8, %v3938_v0  ;;  %v1756_v30 = vpop.permute.xlu0 %1755 }
 0x33d   : > { %1774 = vst.msk [vmem:[%s5375_s25 + $0x30] sm:$0xff] %vm1767_vm3, %v1756_v30 }
 0x33e   : > { %v3941_v32 = vpop.f32.mrb[114].mxu1  ;;  %3297 = vrot.lane.b32.xlu1 %v3940_v29, %s4673_s26 }
 0x33f   : > { %v3942_v33 = vpop.f32.mrb[115].mxu1 }
 0x340   : > { %v3943_v35 = vadd.f32 %v3942_v33, %v3941_v32  ;;  %v1758_v11 = vpop.permute.xlu1 %1757 }
 0x341   : > { %1775 = vst.msk [vmem:[%s5375_s25 + $0x38] sm:$0xff] %vm1767_vm3, %v1758_v11 }
 0x342   : > { %v3944_v36 = vpop.f32.mrb[116].mxu1  ;;  %3299 = vrot.lane.b32.xlu0 %v3943_v35, %s4673_s26 }
 0x343   : > { %v3945_v37 = vpop.f32.mrb[117].mxu1 }
 0x344   : > { %v3946_v38 = vadd.f32 %v3945_v37, %v3944_v36  ;;  %v2131_v15 = vpop.permute.xlu0 %2130 }
 0x345   : > { %2155 = vst.msk [vmem:[%s5375_s25] sm:$0xff] %vm2154_vm4, %v2131_v15 }
 0x346   : > { %v3947_v39 = vpop.f32.mrb[118].mxu1  ;;  %3301 = vrot.lane.b32.xlu1 %v3946_v38, %s4673_s26 }
 0x347   : > { %v3948_v40 = vpop.f32.mrb[119].mxu1 }
 0x348   : > { %v3949_v41 = vadd.f32 %v3948_v40, %v3947_v39  ;;  %v2133_v42 = vpop.permute.xlu1 %2132 }
 0x349   : > { %2156 = vst.msk [vmem:[%s5375_s25 + $0x8] sm:$0xff] %vm2154_vm4, %v2133_v42 }
 0x34a   : > { %v3950_v44 = vpop.f32.mrb[120].mxu1  ;;  %3303 = vrot.lane.b32.xlu0 %v3949_v41, %s4673_s26 }
 0x34b   : > { %v3951_v18 = vpop.f32.mrb[121].mxu1 }
 0x34c   : > { %v3952_v45 = vadd.f32 %v3951_v18, %v3950_v44  ;;  %v2135_v47 = vpop.permute.xlu0 %2134 }
 0x34d   : > { %2157 = vst.msk [vmem:[%s5375_s25 + $0x10] sm:$0xff] %vm2154_vm4, %v2135_v47 }
 0x34e   : > { %3305 = vrot.lane.b32.xlu1 %v3952_v45, %s4673_s26  ;;  %s3338_s26 = sshll.u32 %s5375_s25, 4  ;;  %s5606_s26 = int_to_ptr.vmem [resolvable:$true] %s3338_s26 }
 0x34f   : > { %s4601_s12 = scalar_lea.vmem %s5606_s26, 1024  ;;  %p4608_p9 = scmp.lt.s32.totalorder %s5606_s26, %s4606_s23 }
 0x350   : > { %v2137_v48 = vpop.permute.xlu1 %2136  ;;  %p4602_p6 = scmp.ne.s32.totalorder %s5606_s26, %s4601_s12  ;;  %p4609_p13 = scmp.lt.s32.totalorder %s4607_s29, %s4601_s12 }
 0x351   : > { %2158 = vst.msk [vmem:[%s5375_s25 + $0x18] sm:$0xff] %vm2154_vm4, %v2137_v48 }
 0x352   : > { %p4603_p12 = pnand %p4602_p6, %p5662_p11  ;;  %p4610_p1 = por %p4609_p13, %p4608_p9 }
 0x354   : > { %v2139_v24 = vpop.permute.xlu0 %2138  ;;  %p4604_p8 = pneg %p4603_p12 }
 0x355   : > { %2159 = vst.msk [vmem:[%s5375_s25 + $0x20] sm:$0xff] %vm2154_vm4, %v2139_v24 }
 0x356   : > { %p4611_p3 = pnand %p4610_p1, %p4604_p8 }
 0x358   : > { %v2141_v43 = vpop.permute.xlu1 %2140 }
 0x359   : > { %2160 = vst.msk [vmem:[%s5375_s25 + $0x28] sm:$0xff] %vm2154_vm4, %v2141_v43 }
 0x35c   : > { %v2143_v49 = vpop.permute.xlu0 %2142 }
 0x35d   : > { %2161 = vst.msk [vmem:[%s5375_s25 + $0x30] sm:$0xff] %vm2154_vm4, %v2143_v49 }
 0x360   : > { %v2145_v51 = vpop.permute.xlu1 %2144 }
 0x361   : > { %2162 = vst.msk [vmem:[%s5375_s25 + $0x38] sm:$0xff] %vm2154_vm4, %v2145_v51 }
 0x364   : > { %v2518_v52 = vpop.permute.xlu0 %2517 }
 0x365   : > { %2542 = vst.msk [vmem:[%s5375_s25] sm:$0xff] %vm2541_vm5, %v2518_v52 }
 0x368   : > { %v2520_v54 = vpop.permute.xlu1 %2519 }
 0x369   : > { %2543 = vst.msk [vmem:[%s5375_s25 + $0x8] sm:$0xff] %vm2541_vm5, %v2520_v54 }
 0x36c   : > { %v2522_v27 = vpop.permute.xlu0 %2521 }
 0x36d   : > { %2544 = vst.msk [vmem:[%s5375_s25 + $0x10] sm:$0xff] %vm2541_vm5, %v2522_v27 }
 0x370   : > { %v2524_v55 = vpop.permute.xlu1 %2523 }
 0x371   : > { %2545 = vst.msk [vmem:[%s5375_s25 + $0x18] sm:$0xff] %vm2541_vm5, %v2524_v55 }
 0x374   : > { %v2526_v46 = vpop.permute.xlu0 %2525 }
 0x375   : > { %2546 = vst.msk [vmem:[%s5375_s25 + $0x20] sm:$0xff] %vm2541_vm5, %v2526_v46 }
 0x378   : > { %v2528_v23 = vpop.permute.xlu1 %2527 }
 0x379   : > { %2547 = vst.msk [vmem:[%s5375_s25 + $0x28] sm:$0xff] %vm2541_vm5, %v2528_v23 }
 0x37c   : > { %v2530_v31 = vpop.permute.xlu0 %2529 }
 0x37d   : > { %2548 = vst.msk [vmem:[%s5375_s25 + $0x30] sm:$0xff] %vm2541_vm5, %v2530_v31 }
 0x380   : > { %v2532_v56 = vpop.permute.xlu1 %2531 }
 0x381   : > { %2549 = vst.msk [vmem:[%s5375_s25 + $0x38] sm:$0xff] %vm2541_vm5, %v2532_v56 }
 0x384   : > { %v2905_v58 = vpop.permute.xlu0 %2904 }
 0x385   : > { %2929 = vst.msk [vmem:[%s5375_s25] sm:$0xff] %vm2928_vm6, %v2905_v58 }
 0x388   : > { %v2907_v50 = vpop.permute.xlu1 %2906 }
 0x389   : > { %2930 = vst.msk [vmem:[%s5375_s25 + $0x8] sm:$0xff] %vm2928_vm6, %v2907_v50 }
 0x38c   : > { %v2909_v59 = vpop.permute.xlu0 %2908 }
 0x38d   : > { %2931 = vst.msk [vmem:[%s5375_s25 + $0x10] sm:$0xff] %vm2928_vm6, %v2909_v59 }
 0x390   : > { %v2911_v61 = vpop.permute.xlu1 %2910 }
 0x391   : > { %2932 = vst.msk [vmem:[%s5375_s25 + $0x18] sm:$0xff] %vm2928_vm6, %v2911_v61 }
 0x394   : > { %v2913_v62 = vpop.permute.xlu0 %2912 }
 0x395   : > { %2933 = vst.msk [vmem:[%s5375_s25 + $0x20] sm:$0xff] %vm2928_vm6, %v2913_v62 }
 0x398   : > { %v2915_v63 = vpop.permute.xlu1 %2914 }
 0x399   : > { %2934 = vst.msk [vmem:[%s5375_s25 + $0x28] sm:$0xff] %vm2928_vm6, %v2915_v63 }
 0x39c   : > { %v2917_v19 = vpop.permute.xlu0 %2916 }
 0x39d   : > { %2935 = vst.msk [vmem:[%s5375_s25 + $0x30] sm:$0xff] %vm2928_vm6, %v2917_v19 }
 0x3a0   : > { %v2919_v53 = vpop.permute.xlu1 %2918 }
 0x3a1   : > { %2936 = vst.msk [vmem:[%s5375_s25 + $0x38] sm:$0xff] %vm2928_vm6, %v2919_v53 }
 0x3a4   : > { %v3292_v34 = vpop.permute.xlu0 %3291 }
 0x3a5   : > { %3316 = vst.msk [vmem:[%s5375_s25] sm:$0xff] %vm3315_vm7, %v3292_v34 }
 0x3a8   : > { %v3294_v2 = vpop.permute.xlu1 %3293 }
 0x3a9   : > { %3317 = vst.msk [vmem:[%s5375_s25 + $0x8] sm:$0xff] %vm3315_vm7, %v3294_v2 }
 0x3ac   : > { %v3296_v3 = vpop.permute.xlu0 %3295 }
 0x3ad   : > { %3318 = vst.msk [vmem:[%s5375_s25 + $0x10] sm:$0xff] %vm3315_vm7, %v3296_v3 }
 0x3b0   : > { %v3298_v5 = vpop.permute.xlu1 %3297 }
 0x3b1   : > { %3319 = vst.msk [vmem:[%s5375_s25 + $0x18] sm:$0xff] %vm3315_vm7, %v3298_v5 }
 0x3b4   : > { %v3300_v57 = vpop.permute.xlu0 %3299 }
 0x3b5   : > { %3320 = vst.msk [vmem:[%s5375_s25 + $0x20] sm:$0xff] %vm3315_vm7, %v3300_v57 }
 0x3b8   : > { %v3302_v6 = vpop.permute.xlu1 %3301 }
 0x3b9   : > { %3321 = vst.msk [vmem:[%s5375_s25 + $0x28] sm:$0xff] %vm3315_vm7, %v3302_v6 }
 0x3bc   : > { %v3304_v7 = vpop.permute.xlu0 %3303 }
 0x3bd   : > { %3322 = vst.msk [vmem:[%s5375_s25 + $0x30] sm:$0xff] %vm3315_vm7, %v3304_v7 }
 0x3c0   : > { %v3306_v9 = vpop.permute.xlu1 %3305 }
 0x3c1   : > { %3323 = vst.msk [vmem:[%s5375_s25 + $0x38] sm:$0xff] %vm3315_vm7, %v3306_v9 }
 0x3c2   : > { %4614 = shalt.err (!%p4611_p3)
}
 0x3c3   : > { %s4615_s30 = scalar_lea.hbm %s5604_s10, 1024  ;;  %s4619_s7 = scalar_lea.hbm %s5655_s4, 4096 }
 0x3c4   : > { %p4616_p4 = scmp.ne.s32.totalorder %s5604_s10, %s4615_s30  ;;  %p4620_p2 = scmp.lt.u32.totalorder %s5604_s10, %s5655_s4 }
 0x3c5   : > { %p4621_p7 = scmp.lt.u32.totalorder %s4619_s7, %s4615_s30  ;;  %p4623_p6 = scmp.lt.u32.totalorder %s4615_s30, %s5604_s10 }
 0x3c6   : > { %p4617_p5 = pnand %p4616_p4, %p5662_p11 }
 0x3c7   : > { %p4622_p10 = por %p4621_p7, %p4620_p2 }
 0x3c8   : > { %p4618_p0 = pneg %p4617_p5 }
 0x3c9   : > { %p4624_p12 = por %p4623_p6, %p4622_p10 }
 0x3cb   : > { %p4625_p8 = pnand %p4624_p12, %p4618_p0 }
 0x3cd   : > { %4628 = shalt.err (!%p4625_p8)
}
 0x3ce   : > { %s4681_s25 = smov 128   ;;  %s4682_s14 = smov 8  }
 0x3cf   : > { %4259 = dma.vmem_to_hbm [thread:$0]  (%p5662_p11), %s5606_s26, 1024, %s5604_s10, %s3325_s11, %s4681_s25, %s4681_s25, %s4682_s14  }
 0x3d0 PF: > { %p4270_p9 = scmp.ge.s32.totalorder %s4667_s18, 2  ;;  %s3353_s22 = sand.u32 1, %s4655_s15  }
 0x3d1   : > { %p5663_p13 = scmp.ne.s32.totalorder %s5660_s28, 0  ;;  %s3354_s8 = scalar_lea.sflag [#allocation4], %s3353_s22 }
 0x3d3   : > { %p4266_p1 = pnand %p4270_p9, %p5663_p13 }
 0x3d5   : > { %4650 = dma.done.wait (!%p4266_p1), %s3354_s8, 1024  }
 0x3d6   : > { %4652 = vsyncadd (!%p4266_p1), %s3354_s8, 4294966272  ;;  %p17_p3 = scmp.ge.s32.totalorder %s4733_s21, 6   ;;  %s5664_s15 = smov %s4659_s16 }
 0x3d7   : > { %s5665_s16 = smov %s4663_s17  ;;  %s5666_s17 = smov %s4745_s24 }
 0x3d8   : > { %s5667_s18 = smov %s4733_s21  ;;  %19 = sbr.rel (!%p17_p3) target bundleno = 5 (0x5), region = 84 }
 0x3df   :  { %3359 = vsyncpa [#allocation3], 1 }
 0x3e0   :  { %3361 = vsyncpa [#allocation3 + $0x1], 1 }
 0x3e1   :  { %3362 = vsyncpa [#allocation4], 1 }
 0x3e2   :  { %3364 = vsyncpa [#allocation4 + $0x1], 1 }

</bundles_post_ra>
